<compile_context>
chip_gen: v7x
topology: tpu7x:2x2x1
jax: 0.10.0
libtpu: 0.0.40
codegen_flags: <defaults>
</compile_context>

<pallas_src>
import functools
import math

import jax
import jax.numpy as jnp
from jax.experimental import pallas as pl
from jax.experimental.pallas import tpu as pltpu

# ---------------------------------------------------------------------------
# Dimensions implied by the forward pass (small synthetic sizes)
# ---------------------------------------------------------------------------
BATCH = 2
IN_CH = 3                        # RGB -> DCT layer emits 16 * 3 channels
IMG = 16                         # input spatial size
DCT_F = 16                       # DCT filters per input channel (fixed 4x4 basis)
DCT_CH = DCT_F * IN_CH           # 48 == self.input_channel in the PyTorch module
KSIZE = 3                        # stem conv kernel
STRIDE = 2                       # stem conv stride
HOUT = IMG // STRIDE             # 8
STEM_CH = 32                     # efficientnet-b0 stem channels
STEM_PAD = 128                   # stem channels zero-padded for lane density
N_FEATURES = 128                 # reduced synthetic head width (b0 uses 1280)
N_CLASS = 5                      # nn.Linear(in_features, 5)
TAPS = KSIZE * KSIZE             # 9 stem conv taps
M = BATCH * HOUT * HOUT          # 128 GEMM rows (one per stem output position)
K1 = TAPS * IN_CH * DCT_F        # 432 raw patch width (stem_tap, channel, dct_tap)
K1P = 512                        # lane-padded patch width (multiple of 128)
MOUT = 8                         # padded output rows  (>= BATCH, sublane multiple)
NOUT = 128                       # padded output lanes (>= N_CLASS, lane multiple)
BN_EPS = 1e-3


# ---------------------------------------------------------------------------
# Fused Pallas kernel: DCT layer -> stem -> conv_head -> pool -> classifier
# ---------------------------------------------------------------------------
def _silu_f32(x):
    # x * sigmoid(x); exp + approx reciprocal both live on the EUP slot.
    return x * pl.reciprocal(1.0 + jnp.exp(-x), approx=True)


def _dct_effnet_kernel(p_ref, wdct_ref, wstem_ref, bstem_ref,
                       whead_ref, bhead_ref, pool_ref, wcls_ref, bcls_ref,
                       o_ref):
    # ---- DCT_Layer: block-diagonal 4x4 DCT per (stem_tap, channel) as ONE dense GEMM,
    #      then DCT_Trunc(|x|) == min(|x|, 8) in f32.  Zero-padded stem taps / K columns
    #      stay exactly zero through the clamp (matches the stem conv's zero padding).
    d = jnp.dot(p_ref[...], wdct_ref[...], preferred_element_type=jnp.float32)
    d = jnp.minimum(jnp.abs(d), 8.0).astype(jnp.bfloat16)          # (128, 512)

    # ---- stem conv 3x3/s2 (BN folded) as ONE dense GEMM over K=512.
    s = jnp.dot(d, wstem_ref[...], preferred_element_type=jnp.float32)
    s = _silu_f32(s + bstem_ref[...])                              # (128, 128) f32
    s = s.astype(jnp.bfloat16)

    # ---- conv_head 1x1 (BN folded) + SiLU.
    f = jnp.dot(s, whead_ref[...], preferred_element_type=jnp.float32)
    f = _silu_f32(f + bhead_ref[...])                              # (128, 128) f32
    f = f.astype(jnp.bfloat16)

    # ---- global average pool as a matmul (1/HW folded into the pool matrix),
    #      then classifier Linear(n_features, 5) padded to lane-dense (8, 128).
    pooled = jnp.dot(pool_ref[...], f, preferred_element_type=jnp.float32)
    logits = jnp.dot(pooled.astype(jnp.bfloat16), wcls_ref[...],
                     preferred_element_type=jnp.float32)
    o_ref[...] = (logits + bcls_ref[...]).astype(o_ref.dtype)      # (8, 128) f32 store


def _fused_forward(patches, w_dct, w_stem, b_stem, w_head, b_head,
                   pool_mat, w_cls, b_cls):
    vmem = pl.BlockSpec(memory_space=pltpu.MemorySpace.VMEM)
    return pl.pallas_call(
        _dct_effnet_kernel,
        out_shape=jax.ShapeDtypeStruct((MOUT, NOUT), jnp.float32),
        in_specs=[vmem] * 9,
        out_specs=vmem,
    )(patches, w_dct, w_stem, b_stem, w_head, b_head, pool_mat, w_cls, b_cls)


# ---------------------------------------------------------------------------
# Plain-JAX glue: DCT basis, nested im2col, BN folding, parameter init
# ---------------------------------------------------------------------------
def dct_basis_16x16():
    """Fixed 4x4 2-D DCT basis; rows = spatial taps (dy*4+dx), cols = filters (k*4+l)."""
    idx = jnp.arange(4, dtype=jnp.float32)
    u = jnp.where(jnp.arange(4) == 0, math.sqrt(1.0 / 4.0), math.sqrt(2.0 / 4.0))
    c = jnp.cos(math.pi / 8.0 * idx[None, :] * (2.0 * idx[:, None] + 1.0))   # (pos, freq)
    a = u[None, :] * c                                                        # (pos, freq)
    basis = a[:, None, :, None] * a[None, :, None, :]                         # (i, j, k, l)
    return basis.reshape(DCT_F, DCT_F).astype(jnp.float32)


def build_stem_patches(x_nchw):
    """One row per stem output position (b, oy, ox): the 432 input values feeding it,
    laid out (stem_tap, channel, dct_tap).  Stem taps that fall in the stem conv's
    zero padding are zero.  Returns (M, K1P) with K zero-padded 432 -> 512.

    Pad equivalence: DCT conv pad=2 on a 16x16 input gives a 17x17 output; the module's
    F.pad with negative left/top crops the FIRST row/column, so the cropped DCT output at
    (y, x) uses input rows/cols [y-1, y+2] -> input padding (top=1, bottom=2, left=1,
    right=2)."""
    b = x_nchw.shape[0]
    xp = jnp.pad(x_nchw, ((0, 0), (0, 0), (1, 2), (1, 2)))          # (B, C, 19, 19)
    taps = [xp[:, :, dy:dy + IMG, dx:dx + IMG]
            for dy in range(4) for dx in range(4)]
    d = jnp.stack(taps, axis=-1)                                    # (B, C, 16, 16, 16)
    d = jnp.transpose(d, (0, 2, 3, 1, 4))                           # (B, 16, 16, C, 16)
    # Stem conv (kernel 3, stride 2, TF-"same"): pad bottom/right by 1 on the DCT output.
    d = jnp.pad(d, ((0, 0), (0, 1), (0, 1), (0, 0), (0, 0)))        # (B, 17, 17, C, 16)
    rows = [d[:, sy:sy + IMG:STRIDE, sx:sx + IMG:STRIDE]
            for sy in range(KSIZE) for sx in range(KSIZE)]          # 9 x (B, 8, 8, C, 16)
    p = jnp.stack(rows, axis=3)                                     # (B, 8, 8, 9, C, 16)
    p = p.reshape(b * HOUT * HOUT, K1)                              # (128, 432)
    return jnp.pad(p, ((0, 0), (0, K1P - K1)))                      # (128, 512)


def fold_bn(w, gamma, beta, mean, var, eps=BN_EPS):
    """Fold inference-mode BatchNorm into a GEMM weight (last axis = out channels) + bias."""
    scale = gamma / jnp.sqrt(var + eps)
    return w * scale, beta - mean * scale


def init_params(key):
    ks = jax.random.split(key, 12)
    p = {}
    # Stem conv: per-tap base weight for 3 input channels, replicated to 48 input channels
    # exactly like init_imagenet_weight (torch.cat of 16 copies along the in-channel axis
    # => stem in-channel j uses base channel j % 3).  The DCT output channel layout is
    # channel-major (j = c*16 + filter), matching the PyTorch per-channel concat.
    base = 0.1 * jax.random.normal(ks[0], (TAPS, IN_CH, STEM_CH), jnp.float32)
    p["stem_w"] = base[:, jnp.arange(DCT_CH) % IN_CH, :]            # (9, 48, 32)
    p["stem_bn"] = (1.0 + 0.01 * jax.random.normal(ks[1], (STEM_CH,)),
                    0.01 * jax.random.normal(ks[2], (STEM_CH,)),
                    0.01 * jax.random.normal(ks[3], (STEM_CH,)),
                    1.0 + 0.01 * jax.random.normal(ks[4], (STEM_CH,)) ** 2)
    # conv_head (1x1): (STEM_CH, N_FEATURES)
    p["head_w"] = 0.1 * jax.random.normal(ks[5], (STEM_CH, N_FEATURES), jnp.float32)
    p["head_bn"] = (1.0 + 0.01 * jax.random.normal(ks[6], (N_FEATURES,)),
                    0.01 * jax.random.normal(ks[7], (N_FEATURES,)),
                    0.01 * jax.random.normal(ks[8], (N_FEATURES,)),
                    1.0 + 0.01 * jax.random.normal(ks[9], (N_FEATURES,)) ** 2)
    # Replaced classifier: nn.Linear(n_features, 5).
    p["cls_w"] = 0.1 * jax.random.normal(ks[10], (N_FEATURES, N_CLASS), jnp.float32)
    p["cls_b"] = 0.01 * jax.random.normal(ks[11], (N_CLASS,), jnp.float32)
    return p


# ---------------------------------------------------------------------------
# Forward pass (mirrors DCT_EfficientNet.forward)
# ---------------------------------------------------------------------------
def dct_efficientnet_forward(params, x_nchw):
    x = x_nchw.astype(jnp.float32)                                  # NCHW (PyTorch)
    patches = build_stem_patches(x).astype(jnp.bfloat16)            # (128, 512)

    # Block-diagonal DCT weight: one fixed 4x4 DCT block per (stem_tap, channel),
    # K/N zero-padded 432 -> 512 for lane-dense MXU operands.
    w_dct = jnp.kron(jnp.eye(TAPS * IN_CH, dtype=jnp.float32), dct_basis_16x16())
    w_dct = jnp.pad(w_dct, ((0, K1P - K1), (0, K1P - K1)))          # (512, 512)

    # Stem conv 3x3/s2 with folded BN, flattened to (432, 32), padded to (512, 128).
    ws, bs = fold_bn(params["stem_w"], *params["stem_bn"])          # (9, 48, 32), (32,)
    ws = jnp.pad(ws.reshape(K1, STEM_CH),
                 ((0, K1P - K1), (0, STEM_PAD - STEM_CH)))          # (512, 128)
    bs = jnp.pad(bs, (0, STEM_PAD - STEM_CH)).reshape(1, STEM_PAD)  # zero bias in padding

    # conv_head 1x1 with folded BN; rows padded 32 -> 128 (padded stem channels are 0).
    wh, bh = fold_bn(params["head_w"], *params["head_bn"])          # (32, 128), (128,)
    wh = jnp.pad(wh, ((0, STEM_PAD - STEM_CH), (0, 0)))             # (128, 128)

    # Pooling matrix (8, 128): per-batch block selection scaled by 1/HW; rows >= BATCH are 0.
    pool = (jnp.arange(M)[None, :] // (HOUT * HOUT)
            == jnp.arange(MOUT)[:, None]).astype(jnp.float32) / float(HOUT * HOUT)

    # Classifier padded to lane-dense (128, 128) / (1, 128); sliced back below.
    wc = jnp.pad(params["cls_w"], ((0, 0), (0, NOUT - N_CLASS)))    # (128, 128)
    bc = jnp.pad(params["cls_b"], (0, NOUT - N_CLASS)).reshape(1, NOUT)

    out = _fused_forward(
        patches,
        w_dct.astype(jnp.bfloat16),
        ws.astype(jnp.bfloat16),
        bs.astype(jnp.float32),
        wh.astype(jnp.bfloat16),
        bh.reshape(1, N_FEATURES).astype(jnp.float32),
        pool.astype(jnp.bfloat16),                                  # 1/64 exact in bf16
        wc.astype(jnp.bfloat16),
        bc.astype(jnp.float32),
    )
    return out[:BATCH, :N_CLASS]


if __name__ == "__main__":
    key = jax.random.PRNGKey(0)
    xkey, pkey = jax.random.split(key)
    x = jax.random.normal(xkey, (BATCH, IN_CH, IMG, IMG), dtype=jnp.float32)  # NCHW
    params = init_params(pkey)

    fwd = jax.jit(functools.partial(dct_efficientnet_forward, params))
    out = jax.block_until_ready(fwd(x))

    assert out.shape == (BATCH, N_CLASS), out.shape
    assert out.dtype == jnp.float32
    assert bool(jnp.all(jnp.isfinite(out)))
    print("KERNEL_OK")
</pallas_src>

<mosaic_0001>
module attributes {stable_mosaic.version = 11 : i64} {
  func.func @_dct_effnet_kernel(%arg0: memref<128x512xbf16, #tpu.memory_space<vmem>>, %arg1: memref<512x512xbf16, #tpu.memory_space<vmem>>, %arg2: memref<512x128xbf16, #tpu.memory_space<vmem>>, %arg3: memref<1x128xf32, #tpu.memory_space<vmem>>, %arg4: memref<128x128xbf16, #tpu.memory_space<vmem>>, %arg5: memref<1x128xf32, #tpu.memory_space<vmem>>, %arg6: memref<8x128xbf16, #tpu.memory_space<vmem>>, %arg7: memref<128x128xbf16, #tpu.memory_space<vmem>>, %arg8: memref<1x128xf32, #tpu.memory_space<vmem>>, %arg9: memref<8x128xf32, #tpu.memory_space<vmem>>) attributes {dimension_semantics = [], scalar_prefetch = 0 : i64, scratch_operands = 0 : i64, tpu.core_type = #tpu.core_type<tc>} {
    %c0 = arith.constant 0 : index
    %c0_0 = arith.constant 0 : index
    %0 = vector.load %arg0[%c0, %c0_0] : memref<128x512xbf16, #tpu.memory_space<vmem>>, vector<128x512xbf16>
    %c0_1 = arith.constant 0 : index
    %c0_2 = arith.constant 0 : index
    %1 = vector.load %arg1[%c0_1, %c0_2] : memref<512x512xbf16, #tpu.memory_space<vmem>>, vector<512x512xbf16>
    %cst = arith.constant dense<0.000000e+00> : vector<128x512xf32>
    %2 = tpu.matmul %0, %1, %cst {dimension_numbers = #tpu.dot_dimension_numbers<[1], [0], [0], [1], [0, 0, 1, 1], [], []>} : vector<128x512xbf16>, vector<512x512xbf16>, vector<128x512xf32> -> vector<128x512xf32>
    %3 = math.absf %2 : vector<128x512xf32>
    %cst_3 = arith.constant 8.000000e+00 : f32
    %4 = vector.broadcast %cst_3 : f32 to vector<128x512xf32>
    %5 = arith.minimumf %3, %4 : vector<128x512xf32>
    %6 = arith.truncf %5 : vector<128x512xf32> to vector<128x512xbf16>
    %c0_4 = arith.constant 0 : index
    %c0_5 = arith.constant 0 : index
    %7 = vector.load %arg2[%c0_4, %c0_5] : memref<512x128xbf16, #tpu.memory_space<vmem>>, vector<512x128xbf16>
    %cst_6 = arith.constant dense<0.000000e+00> : vector<128x128xf32>
    %8 = tpu.matmul %6, %7, %cst_6 {dimension_numbers = #tpu.dot_dimension_numbers<[1], [0], [0], [1], [0, 0, 1, 1], [], []>} : vector<128x512xbf16>, vector<512x128xbf16>, vector<128x128xf32> -> vector<128x128xf32>
    %c0_7 = arith.constant 0 : index
    %c0_8 = arith.constant 0 : index
    %9 = vector.load %arg3[%c0_7, %c0_8] : memref<1x128xf32, #tpu.memory_space<vmem>>, vector<1x128xf32>
    %10 = vector.broadcast %9 : vector<1x128xf32> to vector<128x128xf32>
    %11 = arith.addf %8, %10 : vector<128x128xf32>
    %cst_9 = arith.constant 0.000000e+00 : f32
    %12 = vector.broadcast %cst_9 : f32 to vector<128x128xf32>
    %13 = arith.subf %12, %11 : vector<128x128xf32>
    %14 = math.exp %13 : vector<128x128xf32>
    %cst_10 = arith.constant 1.000000e+00 : f32
    %15 = vector.broadcast %cst_10 : f32 to vector<128x128xf32>
    %16 = arith.addf %15, %14 : vector<128x128xf32>
    %17 = tpu.reciprocal %16 {approx = true} : vector<128x128xf32> -> vector<128x128xf32>
    %18 = arith.mulf %11, %17 : vector<128x128xf32>
    %19 = arith.truncf %18 : vector<128x128xf32> to vector<128x128xbf16>
    %c0_11 = arith.constant 0 : index
    %c0_12 = arith.constant 0 : index
    %20 = vector.load %arg4[%c0_11, %c0_12] : memref<128x128xbf16, #tpu.memory_space<vmem>>, vector<128x128xbf16>
    %cst_13 = arith.constant dense<0.000000e+00> : vector<128x128xf32>
    %21 = tpu.matmul %19, %20, %cst_13 {dimension_numbers = #tpu.dot_dimension_numbers<[1], [0], [0], [1], [0, 0, 1, 1], [], []>} : vector<128x128xbf16>, vector<128x128xbf16>, vector<128x128xf32> -> vector<128x128xf32>
    %c0_14 = arith.constant 0 : index
    %c0_15 = arith.constant 0 : index
    %22 = vector.load %arg5[%c0_14, %c0_15] : memref<1x128xf32, #tpu.memory_space<vmem>>, vector<1x128xf32>
    %23 = vector.broadcast %22 : vector<1x128xf32> to vector<128x128xf32>
    %24 = arith.addf %21, %23 : vector<128x128xf32>
    %cst_16 = arith.constant 0.000000e+00 : f32
    %25 = vector.broadcast %cst_16 : f32 to vector<128x128xf32>
    %26 = arith.subf %25, %24 : vector<128x128xf32>
    %27 = math.exp %26 : vector<128x128xf32>
    %cst_17 = arith.constant 1.000000e+00 : f32
    %28 = vector.broadcast %cst_17 : f32 to vector<128x128xf32>
    %29 = arith.addf %28, %27 : vector<128x128xf32>
    %30 = tpu.reciprocal %29 {approx = true} : vector<128x128xf32> -> vector<128x128xf32>
    %31 = arith.mulf %24, %30 : vector<128x128xf32>
    %32 = arith.truncf %31 : vector<128x128xf32> to vector<128x128xbf16>
    %c0_18 = arith.constant 0 : index
    %c0_19 = arith.constant 0 : index
    %33 = vector.load %arg6[%c0_18, %c0_19] : memref<8x128xbf16, #tpu.memory_space<vmem>>, vector<8x128xbf16>
    %cst_20 = arith.constant dense<0.000000e+00> : vector<8x128xf32>
    %34 = tpu.matmul %33, %32, %cst_20 {dimension_numbers = #tpu.dot_dimension_numbers<[1], [0], [0], [1], [0, 0, 1, 1], [], []>} : vector<8x128xbf16>, vector<128x128xbf16>, vector<8x128xf32> -> vector<8x128xf32>
    %35 = arith.truncf %34 : vector<8x128xf32> to vector<8x128xbf16>
    %c0_21 = arith.constant 0 : index
    %c0_22 = arith.constant 0 : index
    %36 = vector.load %arg7[%c0_21, %c0_22] : memref<128x128xbf16, #tpu.memory_space<vmem>>, vector<128x128xbf16>
    %cst_23 = arith.constant dense<0.000000e+00> : vector<8x128xf32>
    %37 = tpu.matmul %35, %36, %cst_23 {dimension_numbers = #tpu.dot_dimension_numbers<[1], [0], [0], [1], [0, 0, 1, 1], [], []>} : vector<8x128xbf16>, vector<128x128xbf16>, vector<8x128xf32> -> vector<8x128xf32>
    %c0_24 = arith.constant 0 : index
    %c0_25 = arith.constant 0 : index
    %38 = vector.load %arg8[%c0_24, %c0_25] : memref<1x128xf32, #tpu.memory_space<vmem>>, vector<1x128xf32>
    %39 = vector.broadcast %38 : vector<1x128xf32> to vector<8x128xf32>
    %40 = arith.addf %37, %39 : vector<8x128xf32>
    %c0_26 = arith.constant 0 : index
    %c0_27 = arith.constant 0 : index
    %41 = vector.load %arg9[%c0_26, %c0_27] : memref<8x128xf32, #tpu.memory_space<vmem>>, vector<8x128xf32>
    tpu.vector_store %arg9[%c0_26, %c0_27], %40 {strides = array<i32>} : memref<8x128xf32, #tpu.memory_space<vmem>>, vector<8x128xf32>,
    return
  }
}

</mosaic_0001>

<bundles_post_ra>
// kernel: dct_efficientnet_forward.1
= control target key start
LH: loop header
LB: loop body
LE: loop exit
PB: predicated region body
PF: predicated region fallthrough
CT: control target
= control target key end

     0   :  { %vm3524_vm0 = vmmov 0   ;;  %s4364_s1 = inlined_call_operand.vmem [shape: bf16[512,512], index: 1, kind: input, shape index: {}]   ;;  %s4365_s0 = inlined_call_operand.vmem [shape: bf16[128,512], index: 0, kind: input, shape index: {}]   ;;  %s4366_s2 = inlined_call_operand.vmem [shape: bf16[512,128], index: 2, kind: input, shape index: {}]   ;;  %s4367_s4 = inlined_call_operand.vmem [shape: bf16[128,128], index: 4, kind: input, shape index: {}]   ;;  %s4368_s3 = inlined_call_operand.vmem [shape: f32[1,128], index: 3, kind: input, shape index: {}]   ;;  %s4369_s7 = inlined_call_operand.vmem [shape: bf16[128,128], index: 7, kind: input, shape index: {}]   ;;  %s4370_s5 = inlined_call_operand.vmem [shape: f32[1,128], index: 5, kind: input, shape index: {}]   ;;  %s4371_s6 = inlined_call_operand.vmem [shape: bf16[8,128], index: 6, kind: input, shape index: {}]   ;;  %s4372_s8 = inlined_call_operand.vmem [shape: f32[1,128], index: 8, kind: input, shape index: {}]   ;;  %s4373_s9 = inlined_call_operand.vmem [shape: f32[8,128], index: 9, kind: output, shape index: {}]  }
   0x1   :  { %v3107_v0 = vld [vmem:[%s4364_s1 + $0x4] ss:$16 sps:$4 sm:$0xff]   ;;  %v3109_v1 = vld [vmem:[%s4364_s1 + $0xc] ss:$16 sps:$4 sm:$0xff]   ;;  %v3111_v2 = vld [vmem:[%s4364_s1] ss:$16 sps:$4 sm:$0xff]  }
   0x2   :  { %993 = vmatprep.subr.bf16.mxu0 %v3107_v0  ;;  %v3112_v3 = vld [vmem:[%s4364_s1 + $0x8] ss:$16 sps:$4 sm:$0xff]   ;;  %1219 = vmatprep.subr.bf16.mxu1 %v3109_v1  ;;  %v3113_v4 = vld [vmem:[%s4364_s1 + $0x24] ss:$16 sps:$4 sm:$0xff]   ;;  %v3115_v5 = vld [vmem:[%s4364_s1 + $0x2c] ss:$16 sps:$4 sm:$0xff]  }
   0x3   :  { %994 = vmatpush1.bf16.msra.mxu0 %v3111_v2  ;;  %1220 = vmatpush1.bf16.msra.mxu1 %v3112_v3  ;;  %v3117_v6 = vld [vmem:[%s4364_s1 + $0x20] ss:$16 sps:$4 sm:$0xff]   ;;  %v3118_v7 = vld [vmem:[%s4364_s1 + $0x28] ss:$16 sps:$4 sm:$0xff]   ;;  %v3119_v8 = vld [vmem:[%s4364_s1 + $0x44] ss:$16 sps:$4 sm:$0xff]  }
   0x4   :  { %995 = vmatprep.subr.bf16.mxu0 %v3113_v4  ;;  %1221 = vmatprep.subr.bf16.mxu1 %v3115_v5  ;;  %v3121_v9 = vld [vmem:[%s4364_s1 + $0x4c] ss:$16 sps:$4 sm:$0xff]   ;;  %v3123_v10 = vld [vmem:[%s4364_s1 + $0x40] ss:$16 sps:$4 sm:$0xff]   ;;  %v3124_v11 = vld [vmem:[%s4364_s1 + $0x48] ss:$16 sps:$4 sm:$0xff]  }
   0x5   :  { %v3125_v12 = vld [vmem:[%s4364_s1 + $0x64] ss:$16 sps:$4 sm:$0xff]   ;;  %v3127_v13 = vld [vmem:[%s4364_s1 + $0x6c] ss:$16 sps:$4 sm:$0xff]   ;;  %v3129_v14 = vld [vmem:[%s4364_s1 + $0x60] ss:$16 sps:$4 sm:$0xff]  }
   0x6   :  { %v3130_v15 = vld [vmem:[%s4364_s1 + $0x68] ss:$16 sps:$4 sm:$0xff]   ;;  %v3131_v16 = vld [vmem:[%s4364_s1 + $0x84] ss:$16 sps:$4 sm:$0xff]   ;;  %v3133_v17 = vld [vmem:[%s4364_s1 + $0x8c] ss:$16 sps:$4 sm:$0xff]  }
   0x7   :  { %996 = vmatpush1.bf16.msra.mxu0 %v3117_v6  ;;  %1222 = vmatpush1.bf16.msra.mxu1 %v3118_v7  ;;  %v3135_v18 = vld [vmem:[%s4364_s1 + $0x80] ss:$16 sps:$4 sm:$0xff]   ;;  %v3136_v19 = vld [vmem:[%s4364_s1 + $0x88] ss:$16 sps:$4 sm:$0xff]   ;;  %v3137_v20 = vld [vmem:[%s4364_s1 + $0xa4] ss:$16 sps:$4 sm:$0xff]  }
   0x8   :  { %997 = vmatprep.subr.bf16.mxu0 %v3119_v8  ;;  %1223 = vmatprep.subr.bf16.mxu1 %v3121_v9  ;;  %v3139_v21 = vld [vmem:[%s4364_s1 + $0xac] ss:$16 sps:$4 sm:$0xff]   ;;  %v3141_v22 = vld [vmem:[%s4364_s1 + $0xa0] ss:$16 sps:$4 sm:$0xff]   ;;  %v3142_v23 = vld [vmem:[%s4364_s1 + $0xa8] ss:$16 sps:$4 sm:$0xff]  }
   0x9   :  { %v3143_v24 = vld [vmem:[%s4364_s1 + $0xc4] ss:$16 sps:$4 sm:$0xff]   ;;  %v3145_v25 = vld [vmem:[%s4364_s1 + $0xcc] ss:$16 sps:$4 sm:$0xff]   ;;  %v3147_v26 = vld [vmem:[%s4364_s1 + $0xc0] ss:$16 sps:$4 sm:$0xff]  }
   0xa   :  { %v3148_v27 = vld [vmem:[%s4364_s1 + $0xc8] ss:$16 sps:$4 sm:$0xff]   ;;  %v3149_v28 = vld [vmem:[%s4364_s1 + $0xe4] ss:$16 sps:$4 sm:$0xff]   ;;  %v3151_v29 = vld [vmem:[%s4364_s1 + $0xec] ss:$16 sps:$4 sm:$0xff]  }
   0xb   :  { %998 = vmatpush1.bf16.msra.mxu0 %v3123_v10  ;;  %1224 = vmatpush1.bf16.msra.mxu1 %v3124_v11  ;;  %v3153_v30 = vld [vmem:[%s4364_s1 + $0xe0] ss:$16 sps:$4 sm:$0xff]   ;;  %v3154_v31 = vld [vmem:[%s4364_s1 + $0xe8] ss:$16 sps:$4 sm:$0xff]   ;;  %v3155_v32 = vld [vmem:[%s4364_s1 + $0x104] ss:$16 sps:$4 sm:$0xff]  }
   0xc   :  { %999 = vmatprep.subr.bf16.mxu0 %v3125_v12  ;;  %1225 = vmatprep.subr.bf16.mxu1 %v3127_v13  ;;  %v3157_v33 = vld [vmem:[%s4364_s1 + $0x10c] ss:$16 sps:$4 sm:$0xff]   ;;  %v3159_v34 = vld [vmem:[%s4364_s1 + $0x100] ss:$16 sps:$4 sm:$0xff]   ;;  %v3160_v35 = vld [vmem:[%s4364_s1 + $0x108] ss:$16 sps:$4 sm:$0xff]  }
   0xd   :  { %v3161_v36 = vld [vmem:[%s4364_s1 + $0x124] ss:$16 sps:$4 sm:$0xff]   ;;  %v3163_v37 = vld [vmem:[%s4364_s1 + $0x12c] ss:$16 sps:$4 sm:$0xff]   ;;  %v3165_v38 = vld [vmem:[%s4364_s1 + $0x120] ss:$16 sps:$4 sm:$0xff]  }
   0xe   :  { %v3166_v39 = vld [vmem:[%s4364_s1 + $0x128] ss:$16 sps:$4 sm:$0xff]   ;;  %v3167_v40 = vld [vmem:[%s4364_s1 + $0x144] ss:$16 sps:$4 sm:$0xff]   ;;  %v3169_v41 = vld [vmem:[%s4364_s1 + $0x14c] ss:$16 sps:$4 sm:$0xff]  }
   0xf   :  { %1000 = vmatpush1.bf16.msra.mxu0 %v3129_v14  ;;  %1226 = vmatpush1.bf16.msra.mxu1 %v3130_v15  ;;  %v3171_v42 = vld [vmem:[%s4364_s1 + $0x140] ss:$16 sps:$4 sm:$0xff]   ;;  %v3172_v43 = vld [vmem:[%s4364_s1 + $0x148] ss:$16 sps:$4 sm:$0xff]   ;;  %v3173_v44 = vld [vmem:[%s4364_s1 + $0x164] ss:$16 sps:$4 sm:$0xff]  }
  0x10   :  { %1001 = vmatprep.subr.bf16.mxu0 %v3131_v16  ;;  %1227 = vmatprep.subr.bf16.mxu1 %v3133_v17  ;;  %v3175_v45 = vld [vmem:[%s4364_s1 + $0x16c] ss:$16 sps:$4 sm:$0xff]   ;;  %v3177_v46 = vld [vmem:[%s4364_s1 + $0x160] ss:$16 sps:$4 sm:$0xff]   ;;  %v3178_v47 = vld [vmem:[%s4364_s1 + $0x168] ss:$16 sps:$4 sm:$0xff]  }
  0x11   :  { %v3205_v48 = vld [vmem:[%s4365_s0 + $0x4] ss:$16 sps:$4 sm:$0xff]   ;;  %v3181_v50 = vld [vmem:[%s4364_s1 + $0x18c] ss:$16 sps:$4 sm:$0xff]   ;;  %v3183_v51 = vld [vmem:[%s4364_s1 + $0x180] ss:$16 sps:$4 sm:$0xff]  }
  0x12   :  { %v3179_v49 = vld [vmem:[%s4364_s1 + $0x184] ss:$16 sps:$4 sm:$0xff]   ;;  %1025 = vmatprep.mubr.bf16.mxu0 %v3205_v48  ;;  %1251 = vmatprep.mubr.bf16.mxu1 %v3205_v48  ;;  %v3184_v52 = vld [vmem:[%s4364_s1 + $0x188] ss:$16 sps:$4 sm:$0xff]   ;;  %v3187_v54 = vld [vmem:[%s4364_s1 + $0x1ac] ss:$16 sps:$4 sm:$0xff]  }
  0x13   :  { %1002 = vmatpush1.bf16.msra.mxu0 %v3135_v18  ;;  %1228 = vmatpush1.bf16.msra.mxu1 %v3136_v19  ;;  %v3185_v53 = vld [vmem:[%s4364_s1 + $0x1a4] ss:$16 sps:$4 sm:$0xff]   ;;  %v3189_v55 = vld [vmem:[%s4364_s1 + $0x1a0] ss:$16 sps:$4 sm:$0xff]   ;;  %v3190_v56 = vld [vmem:[%s4364_s1 + $0x1a8] ss:$16 sps:$4 sm:$0xff]  }
  0x14   :  { %1003 = vmatprep.subr.bf16.mxu0 %v3137_v20  ;;  %1229 = vmatprep.subr.bf16.mxu1 %v3139_v21  ;;  %v3191_v57 = vld [vmem:[%s4364_s1 + $0x1c4] ss:$16 sps:$4 sm:$0xff]   ;;  %v3193_v58 = vld [vmem:[%s4364_s1 + $0x1cc] ss:$16 sps:$4 sm:$0xff]   ;;  %v3195_v59 = vld [vmem:[%s4364_s1 + $0x1c0] ss:$16 sps:$4 sm:$0xff]  }
  0x15   :  { %v3196_v60 = vld [vmem:[%s4364_s1 + $0x1c8] ss:$16 sps:$4 sm:$0xff]   ;;  %v3197_v61 = vld [vmem:[%s4364_s1 + $0x1e4] ss:$16 sps:$4 sm:$0xff]   ;;  %v3199_v62 = vld [vmem:[%s4364_s1 + $0x1ec] ss:$16 sps:$4 sm:$0xff]  }
  0x16   :  { %v3201_v63 = vld [vmem:[%s4364_s1 + $0x1e0] ss:$16 sps:$4 sm:$0xff]   ;;  %v3202_v0 = vld [vmem:[%s4364_s1 + $0x1e8] ss:$16 sps:$4 sm:$0xff]   ;;  %v3208_v1 = vld [vmem:[%s4364_s1 + $0x204] ss:$16 sps:$4 sm:$0xff]  }
  0x17   :  { %1004 = vmatpush1.bf16.msra.mxu0 %v3141_v22  ;;  %1230 = vmatpush1.bf16.msra.mxu1 %v3142_v23  ;;  %v3211_v2 = vld [vmem:[%s4364_s1 + $0x20c] ss:$16 sps:$4 sm:$0xff]   ;;  %v3203_v3 = vld [vmem:[%s4365_s0] ss:$16 sps:$4 sm:$0xff]   ;;  %v3209_v5 = vld [vmem:[%s4364_s1 + $0x208] ss:$16 sps:$4 sm:$0xff]  }
  0x18   :  { %1005 = vmatprep.subr.bf16.mxu0 %v3143_v24  ;;  %1231 = vmatprep.subr.bf16.mxu1 %v3145_v25  ;;  %v3206_v4 = vld [vmem:[%s4364_s1 + $0x200] ss:$16 sps:$4 sm:$0xff]   ;;  %v3214_v6 = vld [vmem:[%s4364_s1 + $0x224] ss:$16 sps:$4 sm:$0xff]   ;;  %v3217_v7 = vld [vmem:[%s4364_s1 + $0x22c] ss:$16 sps:$4 sm:$0xff]  }
  0x19   :  { %v3218_v8 = vld [vmem:[%s4365_s0 + $0x24] ss:$16 sps:$4 sm:$0xff]   ;;  %v3212_v9 = vld [vmem:[%s4364_s1 + $0x220] ss:$16 sps:$4 sm:$0xff]   ;;  %v3215_v10 = vld [vmem:[%s4364_s1 + $0x228] ss:$16 sps:$4 sm:$0xff]  }
  0x1a   :  { %v3223_v11 = vld [vmem:[%s4364_s1 + $0x244] ss:$16 sps:$4 sm:$0xff]   ;;  %v3226_v12 = vld [vmem:[%s4364_s1 + $0x24c] ss:$16 sps:$4 sm:$0xff]   ;;  %v3220_v13 = vld [vmem:[%s4365_s0 + $0x20] ss:$16 sps:$4 sm:$0xff]  }
  0x1b   :  { %1006 = vmatpush1.bf16.msra.mxu0 %v3147_v26  ;;  %1232 = vmatpush1.bf16.msra.mxu1 %v3148_v27  ;;  %v3221_v14 = vld [vmem:[%s4364_s1 + $0x240] ss:$16 sps:$4 sm:$0xff]   ;;  %v3224_v15 = vld [vmem:[%s4364_s1 + $0x248] ss:$16 sps:$4 sm:$0xff]   ;;  %v3229_v16 = vld [vmem:[%s4364_s1 + $0x264] ss:$16 sps:$4 sm:$0xff]  }
  0x1c   :  { %1007 = vmatprep.subr.bf16.mxu0 %v3149_v28  ;;  %1233 = vmatprep.subr.bf16.mxu1 %v3151_v29  ;;  %v3232_v17 = vld [vmem:[%s4364_s1 + $0x26c] ss:$16 sps:$4 sm:$0xff]   ;;  %v3233_v18 = vld [vmem:[%s4365_s0 + $0x44] ss:$16 sps:$4 sm:$0xff]   ;;  %v3227_v19 = vld [vmem:[%s4364_s1 + $0x260] ss:$16 sps:$4 sm:$0xff]  }
  0x1d   :  { %v3230_v20 = vld [vmem:[%s4364_s1 + $0x268] ss:$16 sps:$4 sm:$0xff]   ;;  %v3238_v21 = vld [vmem:[%s4364_s1 + $0x284] ss:$16 sps:$4 sm:$0xff]   ;;  %v3241_v22 = vld [vmem:[%s4364_s1 + $0x28c] ss:$16 sps:$4 sm:$0xff]  }
  0x1e   :  { %v3235_v23 = vld [vmem:[%s4365_s0 + $0x40] ss:$16 sps:$4 sm:$0xff]   ;;  %v3239_v25 = vld [vmem:[%s4364_s1 + $0x288] ss:$16 sps:$4 sm:$0xff]   ;;  %v3244_v26 = vld [vmem:[%s4364_s1 + $0x2a4] ss:$16 sps:$4 sm:$0xff]  }
  0x1f   :  { %1008 = vmatpush1.bf16.msra.mxu0 %v3153_v30  ;;  %1234 = vmatpush1.bf16.msra.mxu1 %v3154_v31  ;;  %v3236_v24 = vld [vmem:[%s4364_s1 + $0x280] ss:$16 sps:$4 sm:$0xff]   ;;  %v3247_v27 = vld [vmem:[%s4364_s1 + $0x2ac] ss:$16 sps:$4 sm:$0xff]   ;;  %v3248_v28 = vld [vmem:[%s4365_s0 + $0x64] ss:$16 sps:$4 sm:$0xff]  }
  0x20   :  { %1009 = vmatprep.subr.bf16.mxu0 %v3155_v32  ;;  %1235 = vmatprep.subr.bf16.mxu1 %v3157_v33  ;;  %v3242_v29 = vld [vmem:[%s4364_s1 + $0x2a0] ss:$16 sps:$4 sm:$0xff]   ;;  %v3245_v30 = vld [vmem:[%s4364_s1 + $0x2a8] ss:$16 sps:$4 sm:$0xff]   ;;  %v3253_v31 = vld [vmem:[%s4364_s1 + $0x2c4] ss:$16 sps:$4 sm:$0xff]  }
  0x21   :  { %v3256_v32 = vld [vmem:[%s4364_s1 + $0x2cc] ss:$16 sps:$4 sm:$0xff]   ;;  %v3250_v33 = vld [vmem:[%s4365_s0 + $0x60] ss:$16 sps:$4 sm:$0xff]   ;;  %v3278_v48 = vld [vmem:[%s4365_s0 + $0xa4] ss:$16 sps:$4 sm:$0xff]  }
  0x23   :  { %1010 = vmatpush1.bf16.msra.mxu0 %v3159_v34  ;;  %1236 = vmatpush1.bf16.msra.mxu1 %v3160_v35  ;;  %v3251_v34 = vld [vmem:[%s4364_s1 + $0x2c0] ss:$16 sps:$4 sm:$0xff]   ;;  %v3254_v35 = vld [vmem:[%s4364_s1 + $0x2c8] ss:$16 sps:$4 sm:$0xff]  }
  0x24   :  { %1011 = vmatprep.subr.bf16.mxu0 %v3161_v36  ;;  %1237 = vmatprep.subr.bf16.mxu1 %v3163_v37  ;;  %v3259_v36 = vld [vmem:[%s4364_s1 + $0x2e4] ss:$16 sps:$4 sm:$0xff]   ;;  %v3262_v37 = vld [vmem:[%s4364_s1 + $0x2ec] ss:$16 sps:$4 sm:$0xff]  }
  0x27   :  { %1012 = vmatpush1.bf16.msra.mxu0 %v3165_v38  ;;  %1238 = vmatpush1.bf16.msra.mxu1 %v3166_v39  ;;  %v3263_v38 = vld [vmem:[%s4365_s0 + $0x84] ss:$16 sps:$4 sm:$0xff]   ;;  %v3257_v39 = vld [vmem:[%s4364_s1 + $0x2e0] ss:$16 sps:$4 sm:$0xff]  }
  0x28   :  { %1013 = vmatprep.subr.bf16.mxu0 %v3167_v40  ;;  %1239 = vmatprep.subr.bf16.mxu1 %v3169_v41  ;;  %v3260_v40 = vld [vmem:[%s4364_s1 + $0x2e8] ss:$16 sps:$4 sm:$0xff]   ;;  %v3268_v41 = vld [vmem:[%s4364_s1 + $0x304] ss:$16 sps:$4 sm:$0xff]  }
  0x2b   :  { %1014 = vmatpush1.bf16.msra.mxu0 %v3171_v42  ;;  %1240 = vmatpush1.bf16.msra.mxu1 %v3172_v43  ;;  %v3271_v42 = vld [vmem:[%s4364_s1 + $0x30c] ss:$16 sps:$4 sm:$0xff]   ;;  %v3265_v43 = vld [vmem:[%s4365_s0 + $0x80] ss:$16 sps:$4 sm:$0xff]  }
  0x2c   :  { %1015 = vmatprep.subr.bf16.mxu0 %v3173_v44  ;;  %1241 = vmatprep.subr.bf16.mxu1 %v3175_v45  ;;  %v3266_v44 = vld [vmem:[%s4364_s1 + $0x300] ss:$16 sps:$4 sm:$0xff]   ;;  %v3269_v45 = vld [vmem:[%s4364_s1 + $0x308] ss:$16 sps:$4 sm:$0xff]  }
  0x2f   :  { %1016 = vmatpush1.bf16.msra.mxu0 %v3177_v46  ;;  %1242 = vmatpush1.bf16.msra.mxu1 %v3178_v47  ;;  %v3274_v46 = vld [vmem:[%s4364_s1 + $0x324] ss:$16 sps:$4 sm:$0xff]   ;;  %v3277_v47 = vld [vmem:[%s4364_s1 + $0x32c] ss:$16 sps:$4 sm:$0xff]  }
  0x30   :  { %1017 = vmatprep.subr.bf16.mxu0 %v3179_v49  ;;  %1243 = vmatprep.subr.bf16.mxu1 %v3181_v50  ;;  %v3272_v49 = vld [vmem:[%s4364_s1 + $0x320] ss:$16 sps:$4 sm:$0xff]   ;;  %v3275_v50 = vld [vmem:[%s4364_s1 + $0x328] ss:$16 sps:$4 sm:$0xff]  }
  0x33   :  { %1018 = vmatpush1.bf16.msra.mxu0 %v3183_v51  ;;  %1244 = vmatpush1.bf16.msra.mxu1 %v3184_v52  ;;  %v3283_v51 = vld [vmem:[%s4364_s1 + $0x344] ss:$16 sps:$4 sm:$0xff]   ;;  %v3286_v52 = vld [vmem:[%s4364_s1 + $0x34c] ss:$16 sps:$4 sm:$0xff]  }
  0x34   :  { %1019 = vmatprep.subr.bf16.mxu0 %v3185_v53  ;;  %1245 = vmatprep.subr.bf16.mxu1 %v3187_v54  ;;  %v3280_v53 = vld [vmem:[%s4365_s0 + $0xa0] ss:$16 sps:$4 sm:$0xff]  }
  0x35   :  { %v3281_v54 = vld [vmem:[%s4364_s1 + $0x340] ss:$16 sps:$4 sm:$0xff]  }
  0x37   :  { %1020 = vmatpush1.bf16.msra.mxu0 %v3189_v55  ;;  %1246 = vmatpush1.bf16.msra.mxu1 %v3190_v56  ;;  %v3284_v55 = vld [vmem:[%s4364_s1 + $0x348] ss:$16 sps:$4 sm:$0xff]   ;;  %v3289_v56 = vld [vmem:[%s4364_s1 + $0x364] ss:$16 sps:$4 sm:$0xff]  }
  0x38   :  { %1021 = vmatprep.subr.bf16.mxu0 %v3191_v57  ;;  %1247 = vmatprep.subr.bf16.mxu1 %v3193_v58  ;;  %v3292_v57 = vld [vmem:[%s4364_s1 + $0x36c] ss:$16 sps:$4 sm:$0xff]   ;;  %v3287_v58 = vld [vmem:[%s4364_s1 + $0x360] ss:$16 sps:$4 sm:$0xff]  }
  0x3b   :  { %1022 = vmatpush1.bf16.msra.mxu0 %v3195_v59  ;;  %1248 = vmatpush1.bf16.msra.mxu1 %v3196_v60  ;;  %v3293_v59 = vld [vmem:[%s4365_s0 + $0xc4] ss:$16 sps:$4 sm:$0xff]   ;;  %v3290_v60 = vld [vmem:[%s4364_s1 + $0x368] ss:$16 sps:$4 sm:$0xff]  }
  0x3c   :  { %1023 = vmatprep.subr.bf16.mxu0 %v3197_v61  ;;  %1249 = vmatprep.subr.bf16.mxu1 %v3199_v62  ;;  %v3298_v61 = vld [vmem:[%s4364_s1 + $0x384] ss:$16 sps:$4 sm:$0xff]   ;;  %v3295_v62 = vld [vmem:[%s4365_s0 + $0xc0] ss:$16 sps:$4 sm:$0xff]  }
  0x3f   :  { %1024 = vmatpush1.bf16.msra.mxu0 %v3201_v63  ;;  %1250 = vmatpush1.bf16.msra.mxu1 %v3202_v0  ;;  %v3301_v63 = vld [vmem:[%s4364_s1 + $0x38c] ss:$16 sps:$4 sm:$0xff]   ;;  %v3296_v0 = vld [vmem:[%s4364_s1 + $0x380] ss:$16 sps:$4 sm:$0xff]  }
  0x40   :  { %1106 = vmatprep.subr.bf16.mxu0 %v3208_v1  ;;  %1332 = vmatprep.subr.bf16.mxu1 %v3211_v2  ;;  %v3299_v1 = vld [vmem:[%s4364_s1 + $0x388] ss:$16 sps:$4 sm:$0xff]   ;;  %v3304_v2 = vld [vmem:[%s4364_s1 + $0x3a4] ss:$16 sps:$4 sm:$0xff]  }
  0x42   :  { %1026 = vmatmul.mubr.bf16.vlgmr.msra.gmra.mrb[0].mxu0 %v3203_v3  ;;  %1252 = vmatmul.mubr.bf16.vlgmr.msra.gmra.mrb[0].mxu1 %v3203_v3  ;;  %v3307_v3 = vld [vmem:[%s4364_s1 + $0x3ac] ss:$16 sps:$4 sm:$0xff]  }
  0x43   :  { %1107 = vmatpush1.bf16.msra.mxu0 %v3206_v4  ;;  %1333 = vmatpush1.bf16.msra.mxu1 %v3209_v5  ;;  %v3302_v4 = vld [vmem:[%s4364_s1 + $0x3a0] ss:$16 sps:$4 sm:$0xff]   ;;  %v3308_v5 = vld [vmem:[%s4365_s0 + $0xe4] ss:$16 sps:$4 sm:$0xff]  }
  0x44   :  { %1108 = vmatprep.subr.bf16.mxu0 %v3214_v6  ;;  %1334 = vmatprep.subr.bf16.mxu1 %v3217_v7  ;;  %v3305_v6 = vld [vmem:[%s4364_s1 + $0x3a8] ss:$16 sps:$4 sm:$0xff]   ;;  %v3313_v7 = vld [vmem:[%s4364_s1 + $0x3c4] ss:$16 sps:$4 sm:$0xff]  }
  0x45   :  { %1035 = vmatprep.mubr.bf16.mxu0 %v3218_v8  ;;  %1261 = vmatprep.mubr.bf16.mxu1 %v3218_v8  ;;  %v3310_v8 = vld [vmem:[%s4365_s0 + $0xe0] ss:$16 sps:$4 sm:$0xff]  }
  0x47   :  { %1109 = vmatpush1.bf16.msra.mxu0 %v3212_v9  ;;  %1335 = vmatpush1.bf16.msra.mxu1 %v3215_v10  ;;  %v3316_v9 = vld [vmem:[%s4364_s1 + $0x3cc] ss:$16 sps:$4 sm:$0xff]   ;;  %v3311_v10 = vld [vmem:[%s4364_s1 + $0x3c0] ss:$16 sps:$4 sm:$0xff]  }
  0x48   :  { %1110 = vmatprep.subr.bf16.mxu0 %v3223_v11  ;;  %1336 = vmatprep.subr.bf16.mxu1 %v3226_v12  ;;  %v3314_v11 = vld [vmem:[%s4364_s1 + $0x3c8] ss:$16 sps:$4 sm:$0xff]   ;;  %v3319_v12 = vld [vmem:[%s4364_s1 + $0x3e4] ss:$16 sps:$4 sm:$0xff]  }
  0x4a   :  { %1036 = vmatmul.mubr.bf16.gmra.mrb[4].mxu0 %v3220_v13  ;;  %1262 = vmatmul.mubr.bf16.gmra.mrb[4].mxu1 %v3220_v13  ;;  %v3322_v13 = vld [vmem:[%s4364_s1 + $0x3ec] ss:$16 sps:$4 sm:$0xff]  }
  0x4b   :  { %1111 = vmatpush1.bf16.msra.mxu0 %v3221_v14  ;;  %1337 = vmatpush1.bf16.msra.mxu1 %v3224_v15  ;;  %v3317_v14 = vld [vmem:[%s4364_s1 + $0x3e0] ss:$16 sps:$4 sm:$0xff]   ;;  %v3325_v15 = vld [vmem:[%s4365_s0 + $0xc] ss:$16 sps:$4 sm:$0xff]  }
  0x4c   :  { %1112 = vmatprep.subr.bf16.mxu0 %v3229_v16  ;;  %1338 = vmatprep.subr.bf16.mxu1 %v3232_v17  ;;  %v3320_v16 = vld [vmem:[%s4364_s1 + $0x3e8] ss:$16 sps:$4 sm:$0xff]   ;;  %v3347_v17 = vld [vmem:[%s4366_s2 + $0x40] sm:$0xff]  }
  0x4d   :  { %1045 = vmatprep.mubr.bf16.mxu0 %v3233_v18  ;;  %1271 = vmatprep.mubr.bf16.mxu1 %v3233_v18  ;;  %v3323_v18 = vld [vmem:[%s4365_s0 + $0x8] ss:$16 sps:$4 sm:$0xff]  }
  0x4f   :  { %1113 = vmatpush1.bf16.msra.mxu0 %v3227_v19  ;;  %1339 = vmatpush1.bf16.msra.mxu1 %v3230_v20  ;;  %v3349_v19 = vld [vmem:[%s4366_s2 + $0xc0] sm:$0xff]   ;;  %v3326_v20 = vld [vmem:[%s4365_s0 + $0x2c] ss:$16 sps:$4 sm:$0xff]  }
  0x50   :  { %1114 = vmatprep.subr.bf16.mxu0 %v3238_v21  ;;  %1340 = vmatprep.subr.bf16.mxu1 %v3241_v22  ;;  %v3348_v21 = vld [vmem:[%s4366_s2] sm:$0xff]  }
  0x51   :  { %v3350_v22 = vld [vmem:[%s4366_s2 + $0x80] sm:$0xff]  }
  0x52   :  { %1046 = vmatmul.mubr.bf16.gmra.mrb[8].mxu0 %v3235_v23  ;;  %1272 = vmatmul.mubr.bf16.gmra.mrb[8].mxu1 %v3235_v23  ;;  %v3351_v23 = vld [vmem:[%s4366_s2 + $0x48] sm:$0xff]  }
  0x53   :  { %1115 = vmatpush1.bf16.msra.mxu0 %v3236_v24  ;;  %1341 = vmatpush1.bf16.msra.mxu1 %v3239_v25  ;;  %v3353_v24 = vld [vmem:[%s4366_s2 + $0xc8] sm:$0xff]  }
  0x54   :  { %1116 = vmatprep.subr.bf16.mxu0 %v3244_v26  ;;  %1342 = vmatprep.subr.bf16.mxu1 %v3247_v27  ;;  %v3352_v25 = vld [vmem:[%s4366_s2 + $0x8] sm:$0xff]   ;;  %v3355_v27 = vld [vmem:[%s4366_s2 + $0x50] sm:$0xff]  }
  0x55   :  { %1055 = vmatprep.mubr.bf16.mxu0 %v3248_v28  ;;  %1281 = vmatprep.mubr.bf16.mxu1 %v3248_v28  ;;  %v3354_v26 = vld [vmem:[%s4366_s2 + $0x88] sm:$0xff]   ;;  %v3357_v28 = vld [vmem:[%s4366_s2 + $0xd0] sm:$0xff]  }
  0x57   :  { %1117 = vmatpush1.bf16.msra.mxu0 %v3242_v29  ;;  %1343 = vmatpush1.bf16.msra.mxu1 %v3245_v30  ;;  %v3328_v29 = vld [vmem:[%s4365_s0 + $0x28] ss:$16 sps:$4 sm:$0xff]   ;;  %v3329_v30 = vld [vmem:[%s4365_s0 + $0x4c] ss:$16 sps:$4 sm:$0xff]  }
  0x58   :  { %1118 = vmatprep.subr.bf16.mxu0 %v3253_v31  ;;  %1344 = vmatprep.subr.bf16.mxu1 %v3256_v32  ;;  %v3356_v31 = vld [vmem:[%s4366_s2 + $0x10] sm:$0xff]  }
  0x59   :  { %v3358_v32 = vld [vmem:[%s4366_s2 + $0x90] sm:$0xff]  }
  0x5a   :  { %1056 = vmatmul.mubr.bf16.gmra.mrb[12].mxu0 %v3250_v33  ;;  %1282 = vmatmul.mubr.bf16.gmra.mrb[12].mxu1 %v3250_v33  ;;  %v3359_v33 = vld [vmem:[%s4366_s2 + $0x58] sm:$0xff]  }
  0x5b   :  { %1119 = vmatpush1.bf16.msra.mxu0 %v3251_v34  ;;  %1345 = vmatpush1.bf16.msra.mxu1 %v3254_v35  ;;  %v3361_v34 = vld [vmem:[%s4366_s2 + $0xd8] sm:$0xff]  }
  0x5c   :  { %1120 = vmatprep.subr.bf16.mxu0 %v3259_v36  ;;  %1346 = vmatprep.subr.bf16.mxu1 %v3262_v37  ;;  %v3360_v35 = vld [vmem:[%s4366_s2 + $0x18] sm:$0xff]   ;;  %v3363_v37 = vld [vmem:[%s4366_s2 + $0x60] sm:$0xff]  }
  0x5d   :  { %1065 = vmatprep.mubr.bf16.mxu0 %v3263_v38  ;;  %1291 = vmatprep.mubr.bf16.mxu1 %v3263_v38  ;;  %v3362_v36 = vld [vmem:[%s4366_s2 + $0x98] sm:$0xff]   ;;  %v3365_v38 = vld [vmem:[%s4366_s2 + $0xe0] sm:$0xff]  }
  0x5f   :  { %1121 = vmatpush1.bf16.msra.mxu0 %v3257_v39  ;;  %1347 = vmatpush1.bf16.msra.mxu1 %v3260_v40  ;;  %v3331_v39 = vld [vmem:[%s4365_s0 + $0x48] ss:$16 sps:$4 sm:$0xff]   ;;  %v3332_v40 = vld [vmem:[%s4365_s0 + $0x6c] ss:$16 sps:$4 sm:$0xff]  }
  0x60   :  { %1122 = vmatprep.subr.bf16.mxu0 %v3268_v41  ;;  %1348 = vmatprep.subr.bf16.mxu1 %v3271_v42  ;;  %v3364_v41 = vld [vmem:[%s4366_s2 + $0x20] sm:$0xff]  }
  0x61   :  { %v3366_v42 = vld [vmem:[%s4366_s2 + $0xa0] sm:$0xff]  }
  0x62   :  { %1066 = vmatmul.mubr.bf16.gmra.mrb[16].mxu0 %v3265_v43  ;;  %1292 = vmatmul.mubr.bf16.gmra.mrb[16].mxu1 %v3265_v43  ;;  %v3367_v43 = vld [vmem:[%s4366_s2 + $0x68] sm:$0xff]  }
  0x63   :  { %1123 = vmatpush1.bf16.msra.mxu0 %v3266_v44  ;;  %1349 = vmatpush1.bf16.msra.mxu1 %v3269_v45  ;;  %v3369_v44 = vld [vmem:[%s4366_s2 + $0xe8] sm:$0xff]  }
  0x64   :  { %1124 = vmatprep.subr.bf16.mxu0 %v3274_v46  ;;  %1350 = vmatprep.subr.bf16.mxu1 %v3277_v47  ;;  %v3368_v45 = vld [vmem:[%s4366_s2 + $0x28] sm:$0xff]  }
  0x65   :  { %1075 = vmatprep.mubr.bf16.mxu0 %v3278_v48  ;;  %1301 = vmatprep.mubr.bf16.mxu1 %v3278_v48  ;;  %v3370_v46 = vld [vmem:[%s4366_s2 + $0xa8] sm:$0xff]  }
  0x66   :  { %v3334_v47 = vld [vmem:[%s4365_s0 + $0x68] ss:$16 sps:$4 sm:$0xff]   ;;  %v3335_v48 = vld [vmem:[%s4365_s0 + $0x8c] ss:$16 sps:$4 sm:$0xff]  }
  0x67   :  { %1125 = vmatpush1.bf16.msra.mxu0 %v3272_v49  ;;  %1351 = vmatpush1.bf16.msra.mxu1 %v3275_v50  ;;  %v3337_v49 = vld [vmem:[%s4365_s0 + $0x88] ss:$16 sps:$4 sm:$0xff]   ;;  %v3338_v50 = vld [vmem:[%s4365_s0 + $0xac] ss:$16 sps:$4 sm:$0xff]  }
  0x68   :  { %1126 = vmatprep.subr.bf16.mxu0 %v3283_v51  ;;  %1352 = vmatprep.subr.bf16.mxu1 %v3286_v52  ;;  %v3340_v51 = vld [vmem:[%s4365_s0 + $0xa8] ss:$16 sps:$4 sm:$0xff]   ;;  %v3341_v52 = vld [vmem:[%s4365_s0 + $0xcc] ss:$16 sps:$4 sm:$0xff]  }
  0x6a   :  { %1076 = vmatmul.mubr.bf16.gmra.mrb[20].mxu0 %v3280_v53  ;;  %1302 = vmatmul.mubr.bf16.gmra.mrb[20].mxu1 %v3280_v53  ;;  %v3343_v53 = vld [vmem:[%s4365_s0 + $0xc8] ss:$16 sps:$4 sm:$0xff]  }
  0x6b   :  { %1127 = vmatpush1.bf16.msra.mxu0 %v3281_v54  ;;  %1353 = vmatpush1.bf16.msra.mxu1 %v3284_v55  ;;  %v3344_v54 = vld [vmem:[%s4365_s0 + $0xec] ss:$16 sps:$4 sm:$0xff]   ;;  %v3346_v55 = vld [vmem:[%s4365_s0 + $0xe8] ss:$16 sps:$4 sm:$0xff]  }
  0x6c   :  { %1128 = vmatprep.subr.bf16.mxu0 %v3289_v56  ;;  %1354 = vmatprep.subr.bf16.mxu1 %v3292_v57  ;;  %v3371_v56 = vld [vmem:[%s4366_s2 + $0x70] sm:$0xff]  }
  0x6d   :  { %1085 = vmatprep.mubr.bf16.mxu0 %v3293_v59  ;;  %1311 = vmatprep.mubr.bf16.mxu1 %v3293_v59  ;;  %v3372_v57 = vld [vmem:[%s4366_s2 + $0xf0] sm:$0xff]  }
  0x6e   :  { %v3374_v59 = vld [vmem:[%s4366_s2 + $0xb0] sm:$0xff]  }
  0x6f   :  { %1129 = vmatpush1.bf16.msra.mxu0 %v3287_v58  ;;  %1355 = vmatpush1.bf16.msra.mxu1 %v3290_v60  ;;  %v3373_v58 = vld [vmem:[%s4366_s2 + $0x30] sm:$0xff]   ;;  %v3375_v60 = vld [vmem:[%s4366_s2 + $0x78] sm:$0xff]  }
  0x70   :  { %1130 = vmatprep.subr.bf16.mxu0 %v3298_v61  ;;  %1356 = vmatprep.subr.bf16.mxu1 %v3301_v63  ;;  %v3376_v61 = vld [vmem:[%s4366_s2 + $0xf8] sm:$0xff]  }
  0x71   :  { %v3378_v63 = vld [vmem:[%s4366_s2 + $0xb8] sm:$0xff]  }
  0x72   :  { %1086 = vmatmul.mubr.bf16.gmra.mrb[24].mxu0 %v3295_v62  ;;  %1312 = vmatmul.mubr.bf16.gmra.mrb[24].mxu1 %v3295_v62  ;;  %v3377_v62 = vld [vmem:[%s4366_s2 + $0x38] sm:$0xff]  }
  0x73   :  { %1131 = vmatpush1.bf16.msra.mxu0 %v3296_v0  ;;  %1357 = vmatpush1.bf16.msra.mxu1 %v3299_v1 }
  0x74   :  { %1132 = vmatprep.subr.bf16.mxu0 %v3304_v2  ;;  %1358 = vmatprep.subr.bf16.mxu1 %v3307_v3 }
  0x75   :  { %1095 = vmatprep.mubr.bf16.mxu0 %v3308_v5  ;;  %1321 = vmatprep.mubr.bf16.mxu1 %v3308_v5 }
  0x77   :  { %1133 = vmatpush1.bf16.msra.mxu0 %v3302_v4  ;;  %1359 = vmatpush1.bf16.msra.mxu1 %v3305_v6 }
  0x78   :  { %1134 = vmatprep.subr.bf16.mxu0 %v3313_v7  ;;  %1360 = vmatprep.subr.bf16.mxu1 %v3316_v9 }
  0x7a   :  { %1096 = vmatmul.mubr.bf16.gmra.mrb[28].mxu0 %v3310_v8  ;;  %1322 = vmatmul.mubr.bf16.gmra.mrb[28].mxu1 %v3310_v8 }
  0x7b   :  { %1135 = vmatpush1.bf16.msra.mxu0 %v3311_v10  ;;  %1361 = vmatpush1.bf16.msra.mxu1 %v3314_v11 }
  0x7c   :  { %1136 = vmatprep.subr.bf16.mxu0 %v3319_v12  ;;  %1362 = vmatprep.subr.bf16.mxu1 %v3322_v13 }
  0x7d   :  { %1138 = vmatprep.mubr.bf16.mxu0 %v3325_v15  ;;  %1364 = vmatprep.mubr.bf16.mxu1 %v3325_v15 }
  0x7f   :  { %1137 = vmatpush1.bf16.msra.mxu0 %v3317_v14  ;;  %1363 = vmatpush1.bf16.msra.mxu1 %v3320_v16 }
  0x80   :  { %2807 = vmatprep.subr.bf16.mxu0 %v3347_v17  ;;  %2871 = vmatprep.subr.bf16.mxu1 %v3349_v19 }
  0x82   :  { %1139 = vmatmul.mubr.bf16.vlgmr.msra.gmra.mrb[0].mxu0 %v3323_v18  ;;  %1365 = vmatmul.mubr.bf16.vlgmr.msra.gmra.mrb[0].mxu1 %v3323_v18 }
  0x83   :  { %1148 = vmatprep.mubr.bf16.mxu0 %v3326_v20  ;;  %1374 = vmatprep.mubr.bf16.mxu1 %v3326_v20 }
  0x84   :  { %2808 = vmatpush3.bf16.msra.mxu0 %v3348_v21  ;;  %2872 = vmatpush3.bf16.msra.mxu1 %v3350_v22 }
  0x85   :  { %2809 = vmatprep.subr.bf16.mxu0 %v3351_v23  ;;  %2873 = vmatprep.subr.bf16.mxu1 %v3353_v24 }
  0x88   :  { %2810 = vmatpush3.bf16.msra.mxu0 %v3352_v25  ;;  %2874 = vmatpush3.bf16.msra.mxu1 %v3354_v26 }
  0x89   :  { %2811 = vmatprep.subr.bf16.mxu0 %v3355_v27  ;;  %2875 = vmatprep.subr.bf16.mxu1 %v3357_v28 }
  0x8a   :  { %1149 = vmatmul.mubr.bf16.gmra.mrb[4].mxu0 %v3328_v29  ;;  %1375 = vmatmul.mubr.bf16.gmra.mrb[4].mxu1 %v3328_v29 }
  0x8b   :  { %1158 = vmatprep.mubr.bf16.mxu0 %v3329_v30  ;;  %1384 = vmatprep.mubr.bf16.mxu1 %v3329_v30 }
  0x8c   :  { %2812 = vmatpush3.bf16.msra.mxu0 %v3356_v31  ;;  %2876 = vmatpush3.bf16.msra.mxu1 %v3358_v32 }
  0x8d   :  { %2813 = vmatprep.subr.bf16.mxu0 %v3359_v33  ;;  %2877 = vmatprep.subr.bf16.mxu1 %v3361_v34 }
  0x90   :  { %2814 = vmatpush3.bf16.msra.mxu0 %v3360_v35  ;;  %2878 = vmatpush3.bf16.msra.mxu1 %v3362_v36 }
  0x91   :  { %2815 = vmatprep.subr.bf16.mxu0 %v3363_v37  ;;  %2879 = vmatprep.subr.bf16.mxu1 %v3365_v38 }
  0x92   :  { %1159 = vmatmul.mubr.bf16.gmra.mrb[8].mxu0 %v3331_v39  ;;  %1385 = vmatmul.mubr.bf16.gmra.mrb[8].mxu1 %v3331_v39 }
  0x93   :  { %1168 = vmatprep.mubr.bf16.mxu0 %v3332_v40  ;;  %1394 = vmatprep.mubr.bf16.mxu1 %v3332_v40 }
  0x94   :  { %2816 = vmatpush3.bf16.msra.mxu0 %v3364_v41  ;;  %2880 = vmatpush3.bf16.msra.mxu1 %v3366_v42 }
  0x95   :  { %2817 = vmatprep.subr.bf16.mxu0 %v3367_v43  ;;  %2881 = vmatprep.subr.bf16.mxu1 %v3369_v44 }
  0x98   :  { %2818 = vmatpush3.bf16.msra.mxu0 %v3368_v45  ;;  %2882 = vmatpush3.bf16.msra.mxu1 %v3370_v46 }
  0x99   :  { %2819 = vmatprep.subr.bf16.mxu0 %v3371_v56  ;;  %2883 = vmatprep.subr.bf16.mxu1 %v3372_v57 }
  0x9a   :  { %1169 = vmatmul.mubr.bf16.gmra.mrb[12].mxu0 %v3334_v47  ;;  %1395 = vmatmul.mubr.bf16.gmra.mrb[12].mxu1 %v3334_v47 }
  0x9b   :  { %1178 = vmatprep.mubr.bf16.mxu0 %v3335_v48  ;;  %1404 = vmatprep.mubr.bf16.mxu1 %v3335_v48 }
  0x9c   :  { %2820 = vmatpush3.bf16.msra.mxu0 %v3373_v58  ;;  %2884 = vmatpush3.bf16.msra.mxu1 %v3374_v59 }
  0x9d   :  { %2821 = vmatprep.subr.bf16.mxu0 %v3375_v60  ;;  %2885 = vmatprep.subr.bf16.mxu1 %v3376_v61 }
  0xa0   :  { %2822 = vmatpush3.bf16.msra.mxu0 %v3377_v62  ;;  %2886 = vmatpush3.bf16.msra.mxu1 %v3378_v63 }
  0xa2   :  { %1179 = vmatmul.mubr.bf16.gmra.mrb[16].mxu0 %v3337_v49  ;;  %1405 = vmatmul.mubr.bf16.gmra.mrb[16].mxu1 %v3337_v49 }
  0xa3   :  { %1188 = vmatprep.mubr.bf16.mxu0 %v3338_v50  ;;  %1414 = vmatprep.mubr.bf16.mxu1 %v3338_v50 }
  0xaa   :  { %1189 = vmatmul.mubr.bf16.gmra.mrb[20].mxu0 %v3340_v51  ;;  %1415 = vmatmul.mubr.bf16.gmra.mrb[20].mxu1 %v3340_v51 }
  0xab   :  { %1198 = vmatprep.mubr.bf16.mxu0 %v3341_v52  ;;  %1424 = vmatprep.mubr.bf16.mxu1 %v3341_v52 }
  0xb2   :  { %1199 = vmatmul.mubr.bf16.gmra.mrb[24].mxu0 %v3343_v53  ;;  %1425 = vmatmul.mubr.bf16.gmra.mrb[24].mxu1 %v3343_v53 }
  0xb3   :  { %1208 = vmatprep.mubr.bf16.mxu0 %v3344_v54  ;;  %1434 = vmatprep.mubr.bf16.mxu1 %v3344_v54 }
  0xba   :  { %1209 = vmatmul.mubr.bf16.gmra.mrb[28].mxu0 %v3346_v55  ;;  %1435 = vmatmul.mubr.bf16.gmra.mrb[28].mxu1 %v3346_v55 }
 0x155   :  { %v1140_v0 = vpop.f32.mrb[0].mxu0  ;;  %v1366_v1 = vpop.f32.mrb[0].mxu1 }
 0x156   :  { %v1445_v2 = vand.u32 2147483647, %v1140_v0  ;;  %v1447_v3 = vand.u32 2147483647, %v1366_v1  ;;  %v1142_v4 = vpop.f32.mrb[1].mxu0  ;;  %v1368_v5 = vpop.f32.mrb[1].mxu1 }
 0x157   :  { %v1446_v6 = vand.u32 2147483647, %v1142_v4  ;;  %v1448_v7 = vand.u32 2147483647, %v1368_v5  ;;  %v1144_v8 = vpop.f32.mrb[2].mxu0  ;;  %v1370_v9 = vpop.f32.mrb[2].mxu1 }
 0x158   :  { %v1449_v10 = vand.u32 2147483647, %v1144_v8  ;;  %v1451_v11 = vand.u32 2147483647, %v1370_v9  ;;  %v1509_v12 = vmin.f32 %v1445_v2, 8.0  ;;  %v1511_v13 = vmin.f32 %v1447_v3, 8.0 }
 0x159   :  { %v1146_v14 = vpop.f32.mrb[3].mxu0  ;;  %v1372_v15 = vpop.f32.mrb[3].mxu1  ;;  %v1510_v20 = vmin.f32 %v1446_v6, 8.0  ;;  %v1512_v21 = vmin.f32 %v1448_v7, 8.0 }
 0x15a   :  { %v1513_v16 = vmin.f32 %v1449_v10, 8.0  ;;  %v1515_v17 = vmin.f32 %v1451_v11, 8.0  ;;  %v1450_v18 = vand.u32 2147483647, %v1146_v14  ;;  %v1452_v19 = vand.u32 2147483647, %v1372_v15 }
 0x15c   :  { %v1573_v22 = vpack.c.bf16 %v1513_v16, %v1509_v12  ;;  %v1575_v23 = vpack.c.bf16 %v1515_v17, %v1511_v13  ;;  %v1514_v24 = vmin.f32 %v1450_v18, 8.0  ;;  %v1516_v25 = vmin.f32 %v1452_v19, 8.0 }
 0x15d   :  { %v1150_v26 = vpop.f32.mrb[4].mxu0  ;;  %v1376_v27 = vpop.f32.mrb[4].mxu1 }
 0x15e   :  { %v1574_v28 = vpack.c.bf16 %v1514_v24, %v1510_v20  ;;  %v1576_v29 = vpack.c.bf16 %v1516_v25, %v1512_v21  ;;  %v1453_v30 = vand.u32 2147483647, %v1150_v26  ;;  %v1455_v31 = vand.u32 2147483647, %v1376_v27  ;;  %v1152_v32 = vpop.f32.mrb[5].mxu0  ;;  %v1378_v33 = vpop.f32.mrb[5].mxu1 }
 0x15f   :  { %v1454_v34 = vand.u32 2147483647, %v1152_v32  ;;  %v1456_v35 = vand.u32 2147483647, %v1378_v33  ;;  %v1154_v36 = vpop.f32.mrb[6].mxu0  ;;  %v1380_v37 = vpop.f32.mrb[6].mxu1 }
 0x160   :  { %v1457_v38 = vand.u32 2147483647, %v1154_v36  ;;  %v1459_v39 = vand.u32 2147483647, %v1380_v37  ;;  %1900 = vmatprep.mubr.bf16.mxu0 %v1574_v28  ;;  %1997 = vmatprep.mubr.bf16.mxu1 %v1576_v29  ;;  %v1517_v40 = vmin.f32 %v1453_v30, 8.0  ;;  %v1519_v41 = vmin.f32 %v1455_v31, 8.0 }
 0x161   :  { %v1156_v42 = vpop.f32.mrb[7].mxu0  ;;  %v1382_v43 = vpop.f32.mrb[7].mxu1  ;;  %1901 = vmatmul.mubr.bf16.vlgmr.msra.gmra.mrb[32].mxu0 %v1573_v22  ;;  %1998 = vmatmul.mubr.bf16.vlgmr.msra.gmra.mrb[32].mxu1 %v1575_v23  ;;  %v1518_v48 = vmin.f32 %v1454_v34, 8.0  ;;  %v1520_v49 = vmin.f32 %v1456_v35, 8.0 }
 0x162   :  { %v1521_v44 = vmin.f32 %v1457_v38, 8.0  ;;  %v1523_v45 = vmin.f32 %v1459_v39, 8.0  ;;  %v1458_v46 = vand.u32 2147483647, %v1156_v42  ;;  %v1460_v47 = vand.u32 2147483647, %v1382_v43 }
 0x164   :  { %v1577_v50 = vpack.c.bf16 %v1521_v44, %v1517_v40  ;;  %v1579_v51 = vpack.c.bf16 %v1523_v45, %v1519_v41  ;;  %v1522_v52 = vmin.f32 %v1458_v46, 8.0  ;;  %v1524_v53 = vmin.f32 %v1460_v47, 8.0 }
 0x165   :  { %v1160_v54 = vpop.f32.mrb[8].mxu0  ;;  %v1386_v55 = vpop.f32.mrb[8].mxu1 }
 0x166   :  { %v1578_v56 = vpack.c.bf16 %v1522_v52, %v1518_v48  ;;  %v1580_v57 = vpack.c.bf16 %v1524_v53, %v1520_v49  ;;  %v1461_v58 = vand.u32 2147483647, %v1160_v54  ;;  %v1463_v59 = vand.u32 2147483647, %v1386_v55  ;;  %v1162_v60 = vpop.f32.mrb[9].mxu0  ;;  %v1388_v61 = vpop.f32.mrb[9].mxu1 }
 0x167   :  { %v1462_v62 = vand.u32 2147483647, %v1162_v60  ;;  %v1464_v63 = vand.u32 2147483647, %v1388_v61  ;;  %v1164_v0 = vpop.f32.mrb[10].mxu0  ;;  %v1390_v1 = vpop.f32.mrb[10].mxu1 }
 0x168   :  { %v1465_v2 = vand.u32 2147483647, %v1164_v0  ;;  %v1467_v3 = vand.u32 2147483647, %v1390_v1  ;;  %1908 = vmatprep.mubr.bf16.mxu0 %v1578_v56  ;;  %2005 = vmatprep.mubr.bf16.mxu1 %v1580_v57  ;;  %v1525_v4 = vmin.f32 %v1461_v58, 8.0  ;;  %v1527_v5 = vmin.f32 %v1463_v59, 8.0 }
 0x169   :  { %v1166_v6 = vpop.f32.mrb[11].mxu0  ;;  %v1392_v7 = vpop.f32.mrb[11].mxu1  ;;  %1909 = vmatmul.mubr.bf16.gmra.mrb[36].mxu0 %v1577_v50  ;;  %2006 = vmatmul.mubr.bf16.gmra.mrb[36].mxu1 %v1579_v51  ;;  %v1526_v12 = vmin.f32 %v1462_v62, 8.0  ;;  %v1528_v13 = vmin.f32 %v1464_v63, 8.0 }
 0x16a   :  { %v1529_v8 = vmin.f32 %v1465_v2, 8.0  ;;  %v1531_v9 = vmin.f32 %v1467_v3, 8.0  ;;  %v1466_v10 = vand.u32 2147483647, %v1166_v6  ;;  %v1468_v11 = vand.u32 2147483647, %v1392_v7 }
 0x16c   :  { %v1581_v14 = vpack.c.bf16 %v1529_v8, %v1525_v4  ;;  %v1583_v15 = vpack.c.bf16 %v1531_v9, %v1527_v5  ;;  %v1530_v16 = vmin.f32 %v1466_v10, 8.0  ;;  %v1532_v17 = vmin.f32 %v1468_v11, 8.0 }
 0x16d   :  { %v1170_v18 = vpop.f32.mrb[12].mxu0  ;;  %v1396_v19 = vpop.f32.mrb[12].mxu1 }
 0x16e   :  { %v1582_v20 = vpack.c.bf16 %v1530_v16, %v1526_v12  ;;  %v1584_v21 = vpack.c.bf16 %v1532_v17, %v1528_v13  ;;  %v1469_v22 = vand.u32 2147483647, %v1170_v18  ;;  %v1471_v23 = vand.u32 2147483647, %v1396_v19  ;;  %v1172_v24 = vpop.f32.mrb[13].mxu0  ;;  %v1398_v25 = vpop.f32.mrb[13].mxu1 }
 0x16f   :  { %v1470_v26 = vand.u32 2147483647, %v1172_v24  ;;  %v1472_v27 = vand.u32 2147483647, %v1398_v25  ;;  %v1174_v28 = vpop.f32.mrb[14].mxu0  ;;  %v1400_v29 = vpop.f32.mrb[14].mxu1 }
 0x170   :  { %v1473_v30 = vand.u32 2147483647, %v1174_v28  ;;  %v1475_v31 = vand.u32 2147483647, %v1400_v29  ;;  %1916 = vmatprep.mubr.bf16.mxu0 %v1582_v20  ;;  %2013 = vmatprep.mubr.bf16.mxu1 %v1584_v21  ;;  %v1533_v32 = vmin.f32 %v1469_v22, 8.0  ;;  %v1535_v33 = vmin.f32 %v1471_v23, 8.0 }
 0x171   :  { %v1176_v34 = vpop.f32.mrb[15].mxu0  ;;  %v1402_v35 = vpop.f32.mrb[15].mxu1  ;;  %1917 = vmatmul.mubr.bf16.gmra.mrb[40].mxu0 %v1581_v14  ;;  %2014 = vmatmul.mubr.bf16.gmra.mrb[40].mxu1 %v1583_v15  ;;  %v1534_v40 = vmin.f32 %v1470_v26, 8.0  ;;  %v1536_v41 = vmin.f32 %v1472_v27, 8.0 }
 0x172   :  { %v1537_v36 = vmin.f32 %v1473_v30, 8.0  ;;  %v1539_v37 = vmin.f32 %v1475_v31, 8.0  ;;  %v1474_v38 = vand.u32 2147483647, %v1176_v34  ;;  %v1476_v39 = vand.u32 2147483647, %v1402_v35 }
 0x174   :  { %v1585_v42 = vpack.c.bf16 %v1537_v36, %v1533_v32  ;;  %v1587_v43 = vpack.c.bf16 %v1539_v37, %v1535_v33  ;;  %v1538_v44 = vmin.f32 %v1474_v38, 8.0  ;;  %v1540_v45 = vmin.f32 %v1476_v39, 8.0 }
 0x175   :  { %v1180_v46 = vpop.f32.mrb[16].mxu0  ;;  %v1406_v47 = vpop.f32.mrb[16].mxu1 }
 0x176   :  { %v1586_v48 = vpack.c.bf16 %v1538_v44, %v1534_v40  ;;  %v1588_v49 = vpack.c.bf16 %v1540_v45, %v1536_v41  ;;  %v1477_v50 = vand.u32 2147483647, %v1180_v46  ;;  %v1479_v51 = vand.u32 2147483647, %v1406_v47  ;;  %v1182_v52 = vpop.f32.mrb[17].mxu0  ;;  %v1408_v53 = vpop.f32.mrb[17].mxu1 }
 0x177   :  { %v1478_v54 = vand.u32 2147483647, %v1182_v52  ;;  %v1480_v55 = vand.u32 2147483647, %v1408_v53  ;;  %v1184_v56 = vpop.f32.mrb[18].mxu0  ;;  %v1410_v57 = vpop.f32.mrb[18].mxu1 }
 0x178   :  { %v1481_v58 = vand.u32 2147483647, %v1184_v56  ;;  %v1483_v59 = vand.u32 2147483647, %v1410_v57  ;;  %1924 = vmatprep.mubr.bf16.mxu0 %v1586_v48  ;;  %2021 = vmatprep.mubr.bf16.mxu1 %v1588_v49  ;;  %v1541_v60 = vmin.f32 %v1477_v50, 8.0  ;;  %v1543_v61 = vmin.f32 %v1479_v51, 8.0 }
 0x179   :  { %v1186_v62 = vpop.f32.mrb[19].mxu0  ;;  %v1412_v63 = vpop.f32.mrb[19].mxu1  ;;  %1925 = vmatmul.mubr.bf16.gmra.mrb[44].mxu0 %v1585_v42  ;;  %2022 = vmatmul.mubr.bf16.gmra.mrb[44].mxu1 %v1587_v43  ;;  %v1542_v4 = vmin.f32 %v1478_v54, 8.0  ;;  %v1544_v5 = vmin.f32 %v1480_v55, 8.0 }
 0x17a   :  { %v1545_v0 = vmin.f32 %v1481_v58, 8.0  ;;  %v1547_v1 = vmin.f32 %v1483_v59, 8.0  ;;  %v1482_v2 = vand.u32 2147483647, %v1186_v62  ;;  %v1484_v3 = vand.u32 2147483647, %v1412_v63 }
 0x17c   :  { %v1589_v6 = vpack.c.bf16 %v1545_v0, %v1541_v60  ;;  %v1591_v7 = vpack.c.bf16 %v1547_v1, %v1543_v61  ;;  %v1546_v8 = vmin.f32 %v1482_v2, 8.0  ;;  %v1548_v9 = vmin.f32 %v1484_v3, 8.0 }
 0x17d   :  { %v1190_v10 = vpop.f32.mrb[20].mxu0  ;;  %v1416_v11 = vpop.f32.mrb[20].mxu1 }
 0x17e   :  { %v1590_v12 = vpack.c.bf16 %v1546_v8, %v1542_v4  ;;  %v1592_v13 = vpack.c.bf16 %v1548_v9, %v1544_v5  ;;  %v1485_v14 = vand.u32 2147483647, %v1190_v10  ;;  %v1487_v15 = vand.u32 2147483647, %v1416_v11  ;;  %v1192_v16 = vpop.f32.mrb[21].mxu0  ;;  %v1418_v17 = vpop.f32.mrb[21].mxu1 }
 0x17f   :  { %v1486_v18 = vand.u32 2147483647, %v1192_v16  ;;  %v1488_v19 = vand.u32 2147483647, %v1418_v17  ;;  %v1194_v20 = vpop.f32.mrb[22].mxu0  ;;  %v1420_v21 = vpop.f32.mrb[22].mxu1 }
 0x180   :  { %v1489_v22 = vand.u32 2147483647, %v1194_v20  ;;  %v1491_v23 = vand.u32 2147483647, %v1420_v21  ;;  %1932 = vmatprep.mubr.bf16.mxu0 %v1590_v12  ;;  %2029 = vmatprep.mubr.bf16.mxu1 %v1592_v13  ;;  %v1549_v24 = vmin.f32 %v1485_v14, 8.0  ;;  %v1551_v25 = vmin.f32 %v1487_v15, 8.0 }
 0x181   :  { %v1196_v26 = vpop.f32.mrb[23].mxu0  ;;  %v1422_v27 = vpop.f32.mrb[23].mxu1  ;;  %1933 = vmatmul.mubr.bf16.gmra.mrb[48].mxu0 %v1589_v6  ;;  %2030 = vmatmul.mubr.bf16.gmra.mrb[48].mxu1 %v1591_v7  ;;  %v1550_v32 = vmin.f32 %v1486_v18, 8.0  ;;  %v1552_v33 = vmin.f32 %v1488_v19, 8.0 }
 0x182   :  { %v1553_v28 = vmin.f32 %v1489_v22, 8.0  ;;  %v1555_v29 = vmin.f32 %v1491_v23, 8.0  ;;  %v1490_v30 = vand.u32 2147483647, %v1196_v26  ;;  %v1492_v31 = vand.u32 2147483647, %v1422_v27 }
 0x184   :  { %v1593_v34 = vpack.c.bf16 %v1553_v28, %v1549_v24  ;;  %v1595_v35 = vpack.c.bf16 %v1555_v29, %v1551_v25  ;;  %v1554_v36 = vmin.f32 %v1490_v30, 8.0  ;;  %v1556_v37 = vmin.f32 %v1492_v31, 8.0 }
 0x185   :  { %v1200_v38 = vpop.f32.mrb[24].mxu0  ;;  %v1426_v39 = vpop.f32.mrb[24].mxu1 }
 0x186   :  { %v1594_v40 = vpack.c.bf16 %v1554_v36, %v1550_v32  ;;  %v1596_v41 = vpack.c.bf16 %v1556_v37, %v1552_v33  ;;  %v1493_v42 = vand.u32 2147483647, %v1200_v38  ;;  %v1495_v43 = vand.u32 2147483647, %v1426_v39  ;;  %v1202_v44 = vpop.f32.mrb[25].mxu0  ;;  %v1428_v45 = vpop.f32.mrb[25].mxu1 }
 0x187   :  { %v1494_v46 = vand.u32 2147483647, %v1202_v44  ;;  %v1496_v47 = vand.u32 2147483647, %v1428_v45  ;;  %v1204_v48 = vpop.f32.mrb[26].mxu0  ;;  %v1430_v49 = vpop.f32.mrb[26].mxu1 }
 0x188   :  { %v1497_v50 = vand.u32 2147483647, %v1204_v48  ;;  %v1499_v51 = vand.u32 2147483647, %v1430_v49  ;;  %1940 = vmatprep.mubr.bf16.mxu0 %v1594_v40  ;;  %2037 = vmatprep.mubr.bf16.mxu1 %v1596_v41  ;;  %v1557_v52 = vmin.f32 %v1493_v42, 8.0  ;;  %v1559_v53 = vmin.f32 %v1495_v43, 8.0 }
 0x189   :  { %v1206_v54 = vpop.f32.mrb[27].mxu0  ;;  %v1432_v55 = vpop.f32.mrb[27].mxu1  ;;  %1941 = vmatmul.mubr.bf16.gmra.mrb[52].mxu0 %v1593_v34  ;;  %2038 = vmatmul.mubr.bf16.gmra.mrb[52].mxu1 %v1595_v35  ;;  %v1558_v60 = vmin.f32 %v1494_v46, 8.0  ;;  %v1560_v61 = vmin.f32 %v1496_v47, 8.0  ;;  %v3379_v32 = vld [vmem:[%s4367_s4] sm:$0xff]   ;;  %v3380_v33 = vld [vmem:[%s4367_s4 + $0x8] sm:$0xff]  }
 0x18a   :  { %v1561_v56 = vmin.f32 %v1497_v50, 8.0  ;;  %v1563_v57 = vmin.f32 %v1499_v51, 8.0  ;;  %v1498_v58 = vand.u32 2147483647, %v1206_v54  ;;  %v1500_v59 = vand.u32 2147483647, %v1432_v55  ;;  %2969 = vmatprep.subr.bf16.mxu0 %v3379_v32 }
 0x18b   :  { %2970 = vmatpush3.bf16.msra.mxu0 %v3379_v32  ;;  %v3381_v34 = vld [vmem:[%s4367_s4 + $0x10] sm:$0xff]   ;;  %v3382_v35 = vld [vmem:[%s4367_s4 + $0x18] sm:$0xff]   ;;  %v3383_v36 = vld [vmem:[%s4367_s4 + $0x20] sm:$0xff]  }
 0x18c   :  { %v1597_v62 = vpack.c.bf16 %v1561_v56, %v1557_v52  ;;  %v1599_v63 = vpack.c.bf16 %v1563_v57, %v1559_v53  ;;  %v1562_v0 = vmin.f32 %v1498_v58, 8.0  ;;  %v1564_v1 = vmin.f32 %v1500_v59, 8.0  ;;  %2971 = vmatprep.subr.bf16.mxu0 %v3380_v33  ;;  %v3384_v37 = vld [vmem:[%s4367_s4 + $0x28] sm:$0xff]   ;;  %v3385_v38 = vld [vmem:[%s4367_s4 + $0x30] sm:$0xff]   ;;  %v3386_v39 = vld [vmem:[%s4367_s4 + $0x38] sm:$0xff]  }
 0x18d   :  { %v1210_v2 = vpop.f32.mrb[28].mxu0  ;;  %v1436_v3 = vpop.f32.mrb[28].mxu1  ;;  %v4178_v42 = vld [vmem:[%s4368_s3] ss:$0 sm:$0xff] }
 0x18e   :  { %v1598_v4 = vpack.c.bf16 %v1562_v0, %v1558_v60  ;;  %v1600_v5 = vpack.c.bf16 %v1564_v1, %v1560_v61  ;;  %v1501_v6 = vand.u32 2147483647, %v1210_v2  ;;  %v1503_v7 = vand.u32 2147483647, %v1436_v3  ;;  %v1212_v8 = vpop.f32.mrb[29].mxu0  ;;  %v1438_v9 = vpop.f32.mrb[29].mxu1 }
 0x18f   :  { %v1502_v10 = vand.u32 2147483647, %v1212_v8  ;;  %v1504_v11 = vand.u32 2147483647, %v1438_v9  ;;  %v1214_v12 = vpop.f32.mrb[30].mxu0  ;;  %v1440_v13 = vpop.f32.mrb[30].mxu1  ;;  %2972 = vmatpush3.bf16.msra.mxu0 %v3380_v33 }
 0x190   :  { %v1505_v14 = vand.u32 2147483647, %v1214_v12  ;;  %v1507_v15 = vand.u32 2147483647, %v1440_v13  ;;  %1948 = vmatprep.mubr.bf16.mxu0 %v1598_v4  ;;  %2045 = vmatprep.mubr.bf16.mxu1 %v1600_v5  ;;  %v1565_v16 = vmin.f32 %v1501_v6, 8.0  ;;  %v1567_v17 = vmin.f32 %v1503_v7, 8.0 }
 0x191   :  { %v1216_v18 = vpop.f32.mrb[31].mxu0  ;;  %v1442_v19 = vpop.f32.mrb[31].mxu1  ;;  %1949 = vmatmul.mubr.bf16.gmra.mrb[56].mxu0 %v1597_v62  ;;  %2046 = vmatmul.mubr.bf16.gmra.mrb[56].mxu1 %v1599_v63  ;;  %v1566_v24 = vmin.f32 %v1502_v10, 8.0  ;;  %v1568_v25 = vmin.f32 %v1504_v11, 8.0 }
 0x192   :  { %v1569_v20 = vmin.f32 %v1505_v14, 8.0  ;;  %v1571_v21 = vmin.f32 %v1507_v15, 8.0  ;;  %v1506_v22 = vand.u32 2147483647, %v1216_v18  ;;  %v1508_v23 = vand.u32 2147483647, %v1442_v19  ;;  %2973 = vmatprep.subr.bf16.mxu0 %v3381_v34 }
 0x193   :  { %2974 = vmatpush3.bf16.msra.mxu0 %v3381_v34 }
 0x194   :  { %v1601_v26 = vpack.c.bf16 %v1569_v20, %v1565_v16  ;;  %v1603_v27 = vpack.c.bf16 %v1571_v21, %v1567_v17  ;;  %v1570_v28 = vmin.f32 %v1506_v22, 8.0  ;;  %v1572_v29 = vmin.f32 %v1508_v23, 8.0  ;;  %2975 = vmatprep.subr.bf16.mxu0 %v3382_v35 }
 0x196   :  { %v1602_v30 = vpack.c.bf16 %v1570_v28, %v1566_v24  ;;  %v1604_v31 = vpack.c.bf16 %v1572_v29, %v1568_v25 }
 0x197   :  { %2976 = vmatpush3.bf16.msra.mxu0 %v3382_v35 }
 0x198   :  { %1956 = vmatprep.mubr.bf16.mxu0 %v1602_v30  ;;  %2053 = vmatprep.mubr.bf16.mxu1 %v1604_v31 }
 0x199   :  { %1957 = vmatmul.mubr.bf16.gmra.mrb[60].mxu0 %v1601_v26  ;;  %2054 = vmatmul.mubr.bf16.gmra.mrb[60].mxu1 %v1603_v27 }
 0x19a   :  { %2977 = vmatprep.subr.bf16.mxu0 %v3383_v36 }
 0x19b   :  { %2978 = vmatpush3.bf16.msra.mxu0 %v3383_v36 }
 0x19c   :  { %2979 = vmatprep.subr.bf16.mxu0 %v3384_v37 }
 0x19f   :  { %2980 = vmatpush3.bf16.msra.mxu0 %v3384_v37 }
 0x1a0   :  { %2981 = vmatprep.subr.bf16.mxu0 %v3385_v38 }
 0x1a3   :  { %2982 = vmatpush3.bf16.msra.mxu0 %v3385_v38 }
 0x1a4   :  { %2983 = vmatprep.subr.bf16.mxu0 %v3386_v39 }
 0x1a7   :  { %2984 = vmatpush3.bf16.msra.mxu0 %v3386_v39 }
 0x234   :  { %v2823_v40 = vpop.f32.mrb[32].mxu0  ;;  %v2887_v41 = vpop.f32.mrb[32].mxu1 }
 0x235   :  { %v2824_v43 = vpop.f32.mrb[33].mxu0  ;;  %v2888_v44 = vpop.f32.mrb[33].mxu1 }
 0x236   :  { %v2825_v45 = vadd.f32 %v2824_v43, %v2823_v40  ;;  %v2889_v46 = vadd.f32 %v2888_v44, %v2887_v41  ;;  %v2826_v47 = vpop.f32.mrb[34].mxu0  ;;  %v2890_v48 = vpop.f32.mrb[34].mxu1 }
 0x237   :  { %v2827_v49 = vpop.f32.mrb[35].mxu0  ;;  %v2891_v50 = vpop.f32.mrb[35].mxu1 }
 0x238   :  { %v1903_v51 = vadd.f32 %v2825_v45, %v4178_v42  ;;  %v2828_v52 = vadd.f32 %v2827_v49, %v2826_v47  ;;  %v2892_v53 = vadd.f32 %v2891_v50, %v2890_v48 }
 0x23a   :  { %v4181_v54 = vadd.f32 %v2889_v46, %v1903_v51  ;;  %v1906_v55 = vadd.f32 %v2828_v52, %v4178_v42 }
 0x23c   :  { %v2062_v56 = vsub.f32 0.0, %v4181_v54  ;;  %v4185_v57 = vadd.f32 %v2892_v53, %v1906_v55  ;;  %v2829_v58 = vpop.f32.mrb[36].mxu0  ;;  %v2893_v59 = vpop.f32.mrb[36].mxu1 }
 0x23d   :  { %v2830_v60 = vpop.f32.mrb[37].mxu0  ;;  %v2894_v61 = vpop.f32.mrb[37].mxu1 }
 0x23e   :  { %v2078_v62 = vmul.f32 1.442695, %v2062_v56  ;;  %v2063_v63 = vsub.f32 0.0, %v4185_v57  ;;  %v2831_v0 = vadd.f32 %v2830_v60, %v2829_v58  ;;  %v2895_v1 = vadd.f32 %v2894_v61, %v2893_v59  ;;  %v2832_v2 = vpop.f32.mrb[38].mxu0  ;;  %v2896_v3 = vpop.f32.mrb[38].mxu1 }
 0x23f   :  { %v2833_v4 = vpop.f32.mrb[39].mxu0  ;;  %v2897_v5 = vpop.f32.mrb[39].mxu1 }
 0x240   :  { %3395 = vpow2.f32 %v2078_v62  ;;  %v2080_v6 = vmul.f32 1.442695, %v2063_v63  ;;  %v1911_v7 = vadd.f32 %v2831_v0, %v4178_v42  ;;  %v2834_v8 = vadd.f32 %v2833_v4, %v2832_v2 }
 0x241   :  { %v2898_v9 = vadd.f32 %v2897_v5, %v2896_v3 }
 0x242   :  { %3397 = vpow2.f32 %v2080_v6  ;;  %v4189_v10 = vadd.f32 %v2895_v1, %v1911_v7  ;;  %v1914_v11 = vadd.f32 %v2834_v8, %v4178_v42 }
 0x244   :  { %v2064_v12 = vsub.f32 0.0, %v4189_v10  ;;  %v4193_v13 = vadd.f32 %v2898_v9, %v1914_v11  ;;  %v2835_v14 = vpop.f32.mrb[40].mxu0  ;;  %v2899_v15 = vpop.f32.mrb[40].mxu1 }
 0x245   :  { %v2836_v16 = vpop.f32.mrb[41].mxu0  ;;  %v2900_v17 = vpop.f32.mrb[41].mxu1 }
 0x246   :  { %v2082_v18 = vmul.f32 1.442695, %v2064_v12  ;;  %v2065_v19 = vsub.f32 0.0, %v4193_v13  ;;  %v2837_v20 = vadd.f32 %v2836_v16, %v2835_v14  ;;  %v2901_v21 = vadd.f32 %v2900_v17, %v2899_v15  ;;  %v2838_v22 = vpop.f32.mrb[42].mxu0  ;;  %v2902_v23 = vpop.f32.mrb[42].mxu1 }
 0x247   :  { %v2839_v24 = vpop.f32.mrb[43].mxu0  ;;  %v2903_v25 = vpop.f32.mrb[43].mxu1 }
 0x248   :  { %3399 = vpow2.f32 %v2082_v18  ;;  %v2084_v26 = vmul.f32 1.442695, %v2065_v19  ;;  %v1919_v27 = vadd.f32 %v2837_v20, %v4178_v42  ;;  %v2840_v28 = vadd.f32 %v2839_v24, %v2838_v22 }
 0x249   :  { %v2904_v29 = vadd.f32 %v2903_v25, %v2902_v23 }
 0x24a   :  { %v3396_v30 = vpop.eup %3395  ;;  %3401 = vpow2.f32 %v2084_v26  ;;  %v4197_v31 = vadd.f32 %v2901_v21, %v1919_v27  ;;  %v1922_v32 = vadd.f32 %v2840_v28, %v4178_v42 }
 0x24b   :  { %v2110_v33 = vadd.f32 1.0, %v3396_v30 }
 0x24c   :  { %v3398_v34 = vpop.eup %3397  ;;  %v2066_v35 = vsub.f32 0.0, %v4197_v31  ;;  %v4201_v36 = vadd.f32 %v2904_v29, %v1922_v32  ;;  %v2841_v37 = vpop.f32.mrb[44].mxu0 }
 0x24d   :  { %v2905_v38 = vpop.f32.mrb[44].mxu1  ;;  %3403 = vrcp.f32 %v2110_v33  ;;  %v2111_v39 = vadd.f32 1.0, %v3398_v34  ;;  %v2842_v40 = vpop.f32.mrb[45].mxu0 }
 0x24e   :  { %v2906_v41 = vpop.f32.mrb[45].mxu1  ;;  %v2086_v43 = vmul.f32 1.442695, %v2066_v35  ;;  %v2067_v44 = vsub.f32 0.0, %v4201_v36  ;;  %v2843_v45 = vadd.f32 %v2842_v40, %v2841_v37  ;;  %v2844_v47 = vpop.f32.mrb[46].mxu0 }
 0x24f   :  { %v2907_v46 = vadd.f32 %v2906_v41, %v2905_v38  ;;  %v2908_v48 = vpop.f32.mrb[46].mxu1  ;;  %3405 = vrcp.f32 %v2111_v39  ;;  %v2845_v49 = vpop.f32.mrb[47].mxu0 }
 0x250   :  { %v2909_v50 = vpop.f32.mrb[47].mxu1  ;;  %3407 = vpow2.f32 %v2086_v43  ;;  %v2088_v51 = vmul.f32 1.442695, %v2067_v44  ;;  %v1927_v52 = vadd.f32 %v2843_v45, %v4178_v42  ;;  %v2846_v53 = vadd.f32 %v2845_v49, %v2844_v47 }
 0x251   :  { %v2910_v55 = vadd.f32 %v2909_v50, %v2908_v48 }
 0x252   :  { %v3400_v56 = vpop.eup %3399  ;;  %3409 = vpow2.f32 %v2088_v51  ;;  %v4205_v58 = vadd.f32 %v2907_v46, %v1927_v52  ;;  %v1930_v59 = vadd.f32 %v2846_v53, %v4178_v42 }
 0x253   :  { %v2112_v60 = vadd.f32 1.0, %v3400_v56 }
 0x254   :  { %v3402_v61 = vpop.eup %3401  ;;  %v2068_v62 = vsub.f32 0.0, %v4205_v58  ;;  %v4209_v63 = vadd.f32 %v2910_v55, %v1930_v59  ;;  %v2847_v0 = vpop.f32.mrb[48].mxu0 }
 0x255   :  { %v2911_v1 = vpop.f32.mrb[48].mxu1  ;;  %3411 = vrcp.f32 %v2112_v60  ;;  %v2113_v2 = vadd.f32 1.0, %v3402_v61  ;;  %v2848_v3 = vpop.f32.mrb[49].mxu0 }
 0x256   :  { %v2912_v4 = vpop.f32.mrb[49].mxu1  ;;  %v2090_v5 = vmul.f32 1.442695, %v2068_v62  ;;  %v2069_v6 = vsub.f32 0.0, %v4209_v63  ;;  %v2849_v7 = vadd.f32 %v2848_v3, %v2847_v0  ;;  %v2850_v9 = vpop.f32.mrb[50].mxu0 }
 0x257   :  { %v2913_v8 = vadd.f32 %v2912_v4, %v2911_v1  ;;  %v2914_v11 = vpop.f32.mrb[50].mxu1  ;;  %v3404_v12 = vpop.eup %3403  ;;  %3413 = vrcp.f32 %v2113_v2 }
 0x258   :  { %v2851_v14 = vpop.f32.mrb[51].mxu0  ;;  %v2915_v15 = vpop.f32.mrb[51].mxu1  ;;  %3415 = vpow2.f32 %v2090_v5  ;;  %v2092_v16 = vmul.f32 1.442695, %v2069_v6  ;;  %v1935_v17 = vadd.f32 %v2849_v7, %v4178_v42  ;;  %v2142_v22 = vmul.f32 %v3404_v12, %v4181_v54 }
 0x259   :  { %v3406_v18 = vpop.eup %3405  ;;  %v2852_v19 = vadd.f32 %v2851_v14, %v2850_v9  ;;  %v2916_v20 = vadd.f32 %v2915_v15, %v2914_v11 }
 0x25a   :  { %v3408_v21 = vpop.eup %3407  ;;  %v2143_v23 = vmul.f32 %v3406_v18, %v4185_v57  ;;  %3417 = vpow2.f32 %v2092_v16  ;;  %v4215_v24 = vadd.f32 %v2913_v8, %v1935_v17 }
 0x25b   :  { %v2114_v25 = vadd.f32 1.0, %v3408_v21  ;;  %v1938_v26 = vadd.f32 %v2852_v19, %v4178_v42 }
 0x25c   :  { %v3410_v27 = vpop.eup %3409  ;;  %v2070_v28 = vsub.f32 0.0, %v4215_v24  ;;  %v2853_v29 = vpop.f32.mrb[52].mxu0  ;;  %v2158_v32 = vpack.c.bf16 %v2143_v23, %v2142_v22 }
 0x25d   :  { %v2917_v30 = vpop.f32.mrb[52].mxu1  ;;  %3419 = vrcp.f32 %v2114_v25  ;;  %v2115_v33 = vadd.f32 1.0, %v3410_v27  ;;  %v4219_v34 = vadd.f32 %v2916_v20, %v1938_v26  ;;  %v2854_v35 = vpop.f32.mrb[53].mxu0 }
 0x25e   :  { %v2918_v54 = vpop.f32.mrb[53].mxu1  ;;  %v2094_v37 = vmul.f32 1.442695, %v2070_v28  ;;  %v2855_v57 = vadd.f32 %v2854_v35, %v2853_v29  ;;  %v2856_v39 = vpop.f32.mrb[54].mxu0  ;;  %2985 = vmatprep.mubr.bf16.mxu0 %v2158_v32 }
 0x25f   :  { %v2919_v38 = vadd.f32 %v2918_v54, %v2917_v30  ;;  %v2920_v40 = vpop.f32.mrb[54].mxu1  ;;  %v3412_v41 = vpop.eup %3411  ;;  %3421 = vrcp.f32 %v2115_v33  ;;  %v2071_v43 = vsub.f32 0.0, %v4219_v34 }
 0x260   :  { %v2857_v44 = vpop.f32.mrb[55].mxu0  ;;  %v2921_v45 = vpop.f32.mrb[55].mxu1  ;;  %3423 = vpow2.f32 %v2094_v37  ;;  %v1943_v46 = vadd.f32 %v2855_v57, %v4178_v42  ;;  %v2144_v52 = vmul.f32 %v3412_v41, %v4189_v10 }
 0x261   :  { %v2858_v47 = vadd.f32 %v2857_v44, %v2856_v39  ;;  %v3414_v48 = vpop.eup %3413  ;;  %v2096_v49 = vmul.f32 1.442695, %v2071_v43  ;;  %v2922_v50 = vadd.f32 %v2921_v45, %v2920_v40 }
 0x262   :  { %v3416_v51 = vpop.eup %3415  ;;  %v2145_v53 = vmul.f32 %v3414_v48, %v4193_v13  ;;  %v4225_v55 = vadd.f32 %v2919_v38, %v1943_v46 }
 0x263   :  { %v1946_v56 = vadd.f32 %v2858_v47, %v4178_v42  ;;  %v2116_v59 = vadd.f32 1.0, %v3416_v51  ;;  %3425 = vpow2.f32 %v2096_v49 }
 0x264   :  { %v3418_v60 = vpop.eup %3417  ;;  %v2159_v61 = vpack.c.bf16 %v2145_v53, %v2144_v52  ;;  %v2072_v62 = vsub.f32 0.0, %v4225_v55  ;;  %v2859_v1 = vpop.f32.mrb[56].mxu0 }
 0x265   :  { %v4229_v0 = vadd.f32 %v2922_v50, %v1946_v56  ;;  %v2923_v2 = vpop.f32.mrb[56].mxu1  ;;  %3427 = vrcp.f32 %v2116_v59  ;;  %v2117_v3 = vadd.f32 1.0, %v3418_v60  ;;  %v2860_v4 = vpop.f32.mrb[57].mxu0 }
 0x266   :  { %v2924_v10 = vpop.f32.mrb[57].mxu1  ;;  %v2098_v5 = vmul.f32 1.442695, %v2072_v62  ;;  %v2861_v6 = vadd.f32 %v2860_v4, %v2859_v1  ;;  %v2862_v8 = vpop.f32.mrb[58].mxu0  ;;  %2986 = vmatmul.mubr.bf16.vlgmr.msra.gmra.mrb[64].mxu0 %v2159_v61 }
 0x267   :  { %v2073_v13 = vsub.f32 0.0, %v4229_v0  ;;  %v2925_v7 = vadd.f32 %v2924_v10, %v2923_v2  ;;  %v2926_v9 = vpop.f32.mrb[58].mxu1  ;;  %v3420_v11 = vpop.eup %3419  ;;  %3429 = vrcp.f32 %v2117_v3 }
 0x268   :  { %v2863_v12 = vpop.f32.mrb[59].mxu0  ;;  %v2927_v14 = vpop.f32.mrb[59].mxu1  ;;  %3431 = vpow2.f32 %v2098_v5  ;;  %v1951_v16 = vadd.f32 %v2861_v6, %v4178_v42  ;;  %v2146_v21 = vmul.f32 %v3420_v11, %v4197_v31 }
 0x269   :  { %v2100_v15 = vmul.f32 1.442695, %v2073_v13  ;;  %v3422_v17 = vpop.eup %3421  ;;  %v2864_v18 = vadd.f32 %v2863_v12, %v2862_v8  ;;  %v2928_v19 = vadd.f32 %v2927_v14, %v2926_v9 }
 0x26a   :  { %v3424_v20 = vpop.eup %3423  ;;  %v2147_v22 = vmul.f32 %v3422_v17, %v4201_v36  ;;  %v4235_v23 = vadd.f32 %v2925_v7, %v1951_v16 }
 0x26b   :  { %3433 = vpow2.f32 %v2100_v15  ;;  %v2118_v25 = vadd.f32 1.0, %v3424_v20  ;;  %v1954_v26 = vadd.f32 %v2864_v18, %v4178_v42 }
 0x26c   :  { %v2074_v27 = vsub.f32 0.0, %v4235_v23  ;;  %v2865_v28 = vpop.f32.mrb[60].mxu0  ;;  %v2929_v29 = vpop.f32.mrb[60].mxu1  ;;  %v2160_v30 = vpack.c.bf16 %v2147_v22, %v2146_v21 }
 0x26d   :  { %v3426_v32 = vpop.eup %3425  ;;  %3435 = vrcp.f32 %v2118_v25  ;;  %v4239_v33 = vadd.f32 %v2928_v19, %v1954_v26  ;;  %v2866_v35 = vpop.f32.mrb[61].mxu0 }
 0x26e   :  { %v2930_v54 = vpop.f32.mrb[61].mxu1  ;;  %v2119_v31 = vadd.f32 1.0, %v3426_v32  ;;  %v2102_v37 = vmul.f32 1.442695, %v2074_v27  ;;  %v2867_v36 = vadd.f32 %v2866_v35, %v2865_v28  ;;  %v2868_v38 = vpop.f32.mrb[62].mxu0  ;;  %2989 = vmatprep.mubr.bf16.mxu0 %v2160_v30  ;;  %v3388_v30 = vld [vmem:[%s4369_s7 + $0x8] sm:$0xff]  }
 0x26f   :  { %v2931_v57 = vadd.f32 %v2930_v54, %v2929_v29  ;;  %v2932_v39 = vpop.f32.mrb[62].mxu1  ;;  %v3428_v40 = vpop.eup %3427  ;;  %v2075_v41 = vsub.f32 0.0, %v4239_v33  ;;  %v3523_v29 = vmov 0.0   ;;  %v3389_v32 = vld [vmem:[%s4369_s7 + $0x10] sm:$0xff]   ;;  %v3391_v35 = vld [vmem:[%s4369_s7 + $0x20] sm:$0xff]   ;;  %v3392_v54 = vld [vmem:[%s4369_s7 + $0x28] sm:$0xff]  }
 0x270   :  { %v2869_v43 = vpop.f32.mrb[63].mxu0  ;;  %v2933_v44 = vpop.f32.mrb[63].mxu1  ;;  %3437 = vrcp.f32 %v2119_v31  ;;  %v1959_v45 = vadd.f32 %v2867_v36, %v4178_v42  ;;  %v2148_v51 = vmul.f32 %v3428_v40, %v4205_v58  ;;  %3001 = vmatprep.subr.bf16.mxu1 %v3523_v29  ;;  %3021 = vmatprep.subr.bf16.mxu0 %v3523_v29  ;;  %v3393_v31 = vld [vmem:[%s4369_s7 + $0x30] sm:$0xff]  }
 0x271   :  { %v2870_v46 = vadd.f32 %v2869_v43, %v2868_v38  ;;  %v3430_v47 = vpop.eup %3429  ;;  %3439 = vpow2.f32 %v2102_v37  ;;  %v2104_v48 = vmul.f32 1.442695, %v2075_v41  ;;  %v2934_v49 = vadd.f32 %v2933_v44, %v2932_v39  ;;  %3017 = vmatprep.mubr.msk.bf16.mxu1 %vm3524_vm0, %v3523_v29  ;;  %v4287_v37 = vld [vmem:[%s4370_s5] ss:$0 sm:$0xff] }
 0x272   :  { %v3432_v50 = vpop.eup %3431  ;;  %v2149_v52 = vmul.f32 %v3430_v47, %v4209_v63  ;;  %v2056_v53 = vadd.f32 %v2931_v57, %v1959_v45 }
 0x273   :  { %v1962_v56 = vadd.f32 %v2870_v46, %v4178_v42  ;;  %v2120_v59 = vadd.f32 1.0, %v3432_v50  ;;  %3441 = vpow2.f32 %v2104_v48 }
 0x274   :  { %v2076_v61 = vsub.f32 0.0, %v2056_v53  ;;  %v2161_v1 = vpack.c.bf16 %v2149_v52, %v2148_v51 }
 0x275   :  { %v3434_v60 = vpop.eup %3433  ;;  %v2059_v62 = vadd.f32 %v2934_v49, %v1962_v56  ;;  %3443 = vrcp.f32 %v2120_v59 }
 0x276   :  { %v2121_v2 = vadd.f32 1.0, %v3434_v60  ;;  %v2106_v3 = vmul.f32 1.442695, %v2076_v61  ;;  %2990 = vmatmul.mubr.bf16.gmra.mrb[68].mxu0 %v2161_v1 }
 0x277   :  { %v2077_v4 = vsub.f32 0.0, %v2059_v62  ;;  %v3436_v10 = vpop.eup %3435 }
 0x278   :  { %3445 = vrcp.f32 %v2121_v2  ;;  %v2150_v42 = vmul.f32 %v3436_v10, %v4215_v24 }
 0x279   :  { %3447 = vpow2.f32 %v2106_v3  ;;  %v2108_v58 = vmul.f32 1.442695, %v2077_v4 }
 0x27a   :  { %v3438_v5 = vpop.eup %3437 }
 0x27b   :  { %3449 = vpow2.f32 %v2108_v58  ;;  %v3440_v63 = vpop.eup %3439  ;;  %v2151_v13 = vmul.f32 %v3438_v5, %v4219_v34 }
 0x27c   :  { %v2122_v6 = vadd.f32 1.0, %v3440_v63 }
 0x27d   :  { %v3442_v7 = vpop.eup %3441  ;;  %v2162_v8 = vpack.c.bf16 %v2151_v13, %v2150_v42 }
 0x27e   :  { %3451 = vrcp.f32 %v2122_v6  ;;  %v2123_v9 = vadd.f32 1.0, %v3442_v7 }
 0x27f   :  { %v3444_v11 = vpop.eup %3443  ;;  %2993 = vmatprep.mubr.bf16.mxu0 %v2162_v8 }
 0x280   :  { %3453 = vrcp.f32 %v2123_v9  ;;  %v2152_v15 = vmul.f32 %v3444_v11, %v4225_v55 }
 0x282   :  { %v3446_v12 = vpop.eup %3445 }
 0x283   :  { %v3448_v14 = vpop.eup %3447  ;;  %v2153_v16 = vmul.f32 %v3446_v12, %v4229_v0 }
 0x284   :  { %v2124_v17 = vadd.f32 1.0, %v3448_v14 }
 0x285   :  { %v3450_v18 = vpop.eup %3449  ;;  %v2163_v19 = vpack.c.bf16 %v2153_v16, %v2152_v15 }
 0x286   :  { %3455 = vrcp.f32 %v2124_v17  ;;  %v2125_v24 = vadd.f32 1.0, %v3450_v18 }
 0x287   :  { %2994 = vmatmul.mubr.bf16.gmra.mrb[72].mxu0 %v2163_v19 }
 0x288   :  { %3457 = vrcp.f32 %v2125_v24  ;;  %v3452_v34 = vpop.eup %3451 }
 0x289   :  { %v2154_v21 = vmul.f32 %v3452_v34, %v4235_v23  ;;  %v3387_v23 = vld [vmem:[%s4369_s7] sm:$0xff]  }
 0x28a   :  { %v3454_v20 = vpop.eup %3453  ;;  %3022 = vmatpush3.bf16.msra.mxu0 %v3387_v23 }
 0x28b   :  { %v2155_v22 = vmul.f32 %v3454_v20, %v4239_v33  ;;  %3023 = vmatprep.subr.bf16.mxu0 %v3523_v29  ;;  %v3390_v33 = vld [vmem:[%s4369_s7 + $0x18] sm:$0xff]  }
 0x28d   :  { %v2164_v25 = vpack.c.bf16 %v2155_v22, %v2154_v21 }
 0x28e   :  { %3024 = vmatpush3.bf16.msra.mxu0 %v3388_v30 }
 0x28f   :  { %2997 = vmatprep.mubr.bf16.mxu0 %v2164_v25  ;;  %3025 = vmatprep.subr.bf16.mxu0 %v3523_v29 }
 0x290   :  { %v3456_v26 = vpop.eup %3455 }
 0x291   :  { %v2156_v55 = vmul.f32 %v3456_v26, %v2056_v53 }
 0x292   :  { %v3458_v27 = vpop.eup %3457  ;;  %3026 = vmatpush3.bf16.msra.mxu0 %v3389_v32 }
 0x293   :  { %v2157_v28 = vmul.f32 %v3458_v27, %v2059_v62  ;;  %3027 = vmatprep.subr.bf16.mxu0 %v3523_v29 }
 0x295   :  { %v2165_v0 = vpack.c.bf16 %v2157_v28, %v2156_v55 }
 0x296   :  { %3028 = vmatpush3.bf16.msra.mxu0 %v3390_v33 }
 0x297   :  { %2998 = vmatmul.mubr.bf16.gmra.mrb[76].mxu0 %v2165_v0  ;;  %3029 = vmatprep.subr.bf16.mxu0 %v3523_v29 }
 0x298   :  { %3037 = vmatprep.mubr.msk.bf16.mxu0 %vm3524_vm0, %v3523_v29 }
 0x29a   :  { %3030 = vmatpush3.bf16.msra.mxu0 %v3391_v35 }
 0x29b   :  { %3031 = vmatprep.subr.bf16.mxu0 %v3523_v29 }
 0x29e   :  { %3032 = vmatpush3.bf16.msra.mxu0 %v3392_v54 }
 0x29f   :  { %3033 = vmatprep.subr.bf16.mxu0 %v3523_v29 }
 0x2a2   :  { %3034 = vmatpush3.bf16.msra.mxu0 %v3393_v31 }
 0x2a3   :  { %3035 = vmatprep.subr.bf16.mxu0 %v3523_v29 }
 0x339   :  { %v2987_v36 = vpop.f32.mrb[64].mxu0 }
 0x33a   :  { %v2280_v57 = vadd.f32 %v2987_v36, %v4287_v37  ;;  %v2271_v38 = vpop.f32.mrb[65].mxu0 }
 0x33b   :  { %v2272_v39 = vadd.f32 %v4287_v37, %v2271_v38  ;;  %v2988_v40 = vpop.f32.mrb[66].mxu0 }
 0x33c   :  { %v2336_v41 = vsub.f32 0.0, %v2280_v57  ;;  %v2283_v43 = vadd.f32 %v2988_v40, %v4287_v37  ;;  %v2274_v44 = vpop.f32.mrb[67].mxu0 }
 0x33d   :  { %v2334_v45 = vsub.f32 0.0, %v2272_v39  ;;  %v2275_v46 = vadd.f32 %v4287_v37, %v2274_v44 }
 0x33e   :  { %v2354_v47 = vmul.f32 1.442695, %v2336_v41  ;;  %v2337_v48 = vsub.f32 0.0, %v2283_v43 }
 0x33f   :  { %v2350_v49 = vmul.f32 1.442695, %v2334_v45  ;;  %v2335_v50 = vsub.f32 0.0, %v2275_v46 }
 0x340   :  { %3459 = vpow2.f32 %v2354_v47  ;;  %v2356_v51 = vmul.f32 1.442695, %v2337_v48 }
 0x341   :  { %3461 = vpow2.f32 %v2350_v49  ;;  %v2352_v52 = vmul.f32 1.442695, %v2335_v50 }
 0x342   :  { %3463 = vpow2.f32 %v2356_v51 }
 0x343   :  { %3465 = vpow2.f32 %v2352_v52 }
 0x349   :  { %v2991_v53 = vpop.f32.mrb[68].mxu0 }
 0x34a   :  { %v3460_v56 = vpop.eup %3459  ;;  %v4294_v59 = vadd.f32 %v2991_v53, %v4287_v37  ;;  %v2287_v60 = vpop.f32.mrb[69].mxu0 }
 0x34b   :  { %v3462_v61 = vpop.eup %3461  ;;  %v2384_v62 = vadd.f32 1.0, %v3460_v56  ;;  %v4297_v1 = vadd.f32 %v4287_v37, %v2287_v60  ;;  %v2992_v2 = vpop.f32.mrb[70].mxu0 }
 0x34c   :  { %v3464_v3 = vpop.eup %3463  ;;  %v2382_v4 = vadd.f32 1.0, %v3462_v61  ;;  %v2340_v10 = vsub.f32 0.0, %v4294_v59  ;;  %v4301_v58 = vadd.f32 %v2992_v2, %v4287_v37  ;;  %v2290_v5 = vpop.f32.mrb[71].mxu0 }
 0x34d   :  { %v3466_v63 = vpop.eup %3465  ;;  %3467 = vrcp.f32 %v2384_v62  ;;  %v2385_v42 = vadd.f32 1.0, %v3464_v3  ;;  %v2338_v13 = vsub.f32 0.0, %v4297_v1  ;;  %v4305_v6 = vadd.f32 %v4287_v37, %v2290_v5 }
 0x34e   :  { %3469 = vrcp.f32 %v2382_v4  ;;  %v2383_v7 = vadd.f32 1.0, %v3466_v63  ;;  %v2362_v8 = vmul.f32 1.442695, %v2340_v10  ;;  %v2341_v9 = vsub.f32 0.0, %v4301_v58 }
 0x34f   :  { %3471 = vrcp.f32 %v2385_v42  ;;  %v2358_v11 = vmul.f32 1.442695, %v2338_v13  ;;  %v2339_v12 = vsub.f32 0.0, %v4305_v6 }
 0x350   :  { %3473 = vrcp.f32 %v2383_v7  ;;  %v2364_v14 = vmul.f32 1.442695, %v2341_v9 }
 0x351   :  { %3475 = vpow2.f32 %v2362_v8  ;;  %v2360_v15 = vmul.f32 1.442695, %v2339_v12 }
 0x352   :  { %3477 = vpow2.f32 %v2358_v11 }
 0x353   :  { %3479 = vpow2.f32 %v2364_v14 }
 0x354   :  { %3481 = vpow2.f32 %v2360_v15 }
 0x357   :  { %v3468_v16 = vpop.eup %3467 }
 0x358   :  { %v3470_v17 = vpop.eup %3469  ;;  %v2416_v34 = vmul.f32 %v3468_v16, %v2280_v57 }
 0x359   :  { %v3472_v18 = vpop.eup %3471  ;;  %v2414_v26 = vmul.f32 %v3470_v17, %v2272_v39 }
 0x35a   :  { %v2995_v19 = vpop.f32.mrb[72].mxu0  ;;  %v3474_v24 = vpop.eup %3473  ;;  %v2417_v20 = vmul.f32 %v3472_v18, %v2283_v43 }
 0x35b   :  { %v4310_v21 = vadd.f32 %v2995_v19, %v4287_v37  ;;  %v2303_v22 = vpop.f32.mrb[73].mxu0  ;;  %v3476_v25 = vpop.eup %3475  ;;  %v2415_v27 = vmul.f32 %v3474_v24, %v2275_v46 }
 0x35c   :  { %v4313_v55 = vadd.f32 %v4287_v37, %v2303_v22  ;;  %v2996_v28 = vpop.f32.mrb[74].mxu0  ;;  %v3478_v0 = vpop.eup %3477  ;;  %v2431_v23 = vpack.c.bf16 %v2417_v20, %v2416_v34  ;;  %v2388_v30 = vadd.f32 1.0, %v3476_v25 }
 0x35d   :  { %v2344_v32 = vsub.f32 0.0, %v4310_v21  ;;  %v4317_v33 = vadd.f32 %v2996_v28, %v4287_v37  ;;  %v2306_v35 = vpop.f32.mrb[75].mxu0  ;;  %v3480_v54 = vpop.eup %3479  ;;  %v2430_v31 = vpack.c.bf16 %v2415_v27, %v2414_v26  ;;  %v2386_v36 = vadd.f32 1.0, %v3478_v0 }
 0x35e   :  { %v2342_v57 = vsub.f32 0.0, %v4313_v55  ;;  %v4321_v38 = vadd.f32 %v4287_v37, %v2306_v35  ;;  %v3482_v39 = vpop.eup %3481  ;;  %3483 = vrcp.f32 %v2388_v30  ;;  %v2389_v40 = vadd.f32 1.0, %v3480_v54 }
 0x35f   :  { %v2370_v41 = vmul.f32 1.442695, %v2344_v32  ;;  %v2345_v43 = vsub.f32 0.0, %v4317_v33  ;;  %3485 = vrcp.f32 %v2386_v36  ;;  %v2387_v44 = vadd.f32 1.0, %v3482_v39  ;;  %3002 = vmatpush3.bf16.msra.mxu1 %v2430_v31 }
 0x360   :  { %v2366_v45 = vmul.f32 1.442695, %v2342_v57  ;;  %v2343_v46 = vsub.f32 0.0, %v4321_v38  ;;  %3487 = vrcp.f32 %v2389_v40  ;;  %3003 = vmatprep.subr.bf16.mxu1 %v3523_v29 }
 0x361   :  { %v2372_v47 = vmul.f32 1.442695, %v2345_v43  ;;  %3489 = vrcp.f32 %v2387_v44 }
 0x362   :  { %v2368_v48 = vmul.f32 1.442695, %v2343_v46  ;;  %3491 = vpow2.f32 %v2370_v41 }
 0x363   :  { %3493 = vpow2.f32 %v2366_v45  ;;  %3004 = vmatpush3.bf16.msra.mxu1 %v2431_v23 }
 0x364   :  { %3495 = vpow2.f32 %v2372_v47  ;;  %3005 = vmatprep.subr.bf16.mxu1 %v3523_v29 }
 0x365   :  { %3497 = vpow2.f32 %v2368_v48  ;;  %v2438_v48 = vld [vmem:[%s4371_s6] sm:$0xf] }
 0x368   :  { %v3484_v49 = vpop.eup %3483 }
 0x369   :  { %v3486_v50 = vpop.eup %3485  ;;  %v2420_v61 = vmul.f32 %v3484_v49, %v4294_v59  ;;  %v3394_v49 = vld [vmem:[%s4369_s7 + $0x38] sm:$0xff]  }
 0x36a   :  { %v2999_v51 = vpop.f32.mrb[76].mxu0  ;;  %v3488_v52 = vpop.eup %3487  ;;  %v2418_v10 = vmul.f32 %v3486_v50, %v4297_v1  ;;  %3036 = vmatpush3.bf16.msra.mxu0 %v3394_v49 }
 0x36b   :  { %v4328_v53 = vadd.f32 %v2999_v51, %v4287_v37  ;;  %v2319_v56 = vpop.f32.mrb[77].mxu0  ;;  %v3490_v60 = vpop.eup %3489  ;;  %v2421_v62 = vmul.f32 %v3488_v52, %v4301_v58 }
 0x36c   :  { %v4333_v2 = vadd.f32 %v4287_v37, %v2319_v56  ;;  %v3000_v3 = vpop.f32.mrb[78].mxu0  ;;  %v3492_v4 = vpop.eup %3491  ;;  %v2419_v5 = vmul.f32 %v3490_v60, %v4305_v6 }
 0x36d   :  { %v2348_v63 = vsub.f32 0.0, %v4328_v53  ;;  %v2331_v42 = vadd.f32 %v3000_v3, %v4287_v37  ;;  %v2322_v13 = vpop.f32.mrb[79].mxu0  ;;  %v3494_v7 = vpop.eup %3493  ;;  %v2433_v8 = vpack.c.bf16 %v2421_v62, %v2420_v61  ;;  %v2392_v9 = vadd.f32 1.0, %v3492_v4 }
 0x36e   :  { %v2346_v59 = vsub.f32 0.0, %v4333_v2  ;;  %v2323_v58 = vadd.f32 %v4287_v37, %v2322_v13  ;;  %v3496_v11 = vpop.eup %3495  ;;  %v2432_v12 = vpack.c.bf16 %v2419_v5, %v2418_v10  ;;  %v2390_v14 = vadd.f32 1.0, %v3494_v7 }
 0x36f   :  { %v2349_v15 = vsub.f32 0.0, %v2331_v42  ;;  %v3498_v16 = vpop.eup %3497  ;;  %3499 = vrcp.f32 %v2392_v9  ;;  %v2393_v1 = vadd.f32 1.0, %v3496_v11  ;;  %v2378_v6 = vmul.f32 1.442695, %v2348_v63 }
 0x370   :  { %v2347_v17 = vsub.f32 0.0, %v2323_v58  ;;  %3501 = vrcp.f32 %v2390_v14  ;;  %v2391_v18 = vadd.f32 1.0, %v3498_v16  ;;  %v2374_v19 = vmul.f32 1.442695, %v2346_v59  ;;  %3006 = vmatpush3.bf16.msra.mxu1 %v2432_v12 }
 0x371   :  { %3503 = vrcp.f32 %v2393_v1  ;;  %v2380_v24 = vmul.f32 1.442695, %v2349_v15  ;;  %3007 = vmatprep.subr.bf16.mxu1 %v3523_v29 }
 0x372   :  { %3505 = vrcp.f32 %v2391_v18  ;;  %v2376_v34 = vmul.f32 1.442695, %v2347_v17 }
 0x373   :  { %3507 = vpow2.f32 %v2378_v6 }
 0x374   :  { %3509 = vpow2.f32 %v2374_v19  ;;  %3008 = vmatpush3.bf16.msra.mxu1 %v2433_v8 }
 0x375   :  { %3511 = vpow2.f32 %v2380_v24  ;;  %3009 = vmatprep.subr.bf16.mxu1 %v3523_v29 }
 0x376   :  { %3513 = vpow2.f32 %v2376_v34 }
 0x379   :  { %v3500_v37 = vpop.eup %3499 }
 0x37a   :  { %v3502_v20 = vpop.eup %3501  ;;  %v2424_v26 = vmul.f32 %v3500_v37, %v4310_v21 }
 0x37b   :  { %v3504_v22 = vpop.eup %3503  ;;  %v2422_v0 = vmul.f32 %v3502_v20, %v4313_v55 }
 0x37c   :  { %v3506_v25 = vpop.eup %3505  ;;  %v2425_v27 = vmul.f32 %v3504_v22, %v4317_v33 }
 0x37d   :  { %v3508_v28 = vpop.eup %3507  ;;  %v2423_v23 = vmul.f32 %v3506_v25, %v4321_v38 }
 0x37e   :  { %v3510_v30 = vpop.eup %3509  ;;  %v2435_v32 = vpack.c.bf16 %v2425_v27, %v2424_v26  ;;  %v2396_v35 = vadd.f32 1.0, %v3508_v28 }
 0x37f   :  { %v3512_v54 = vpop.eup %3511  ;;  %v2434_v31 = vpack.c.bf16 %v2423_v23, %v2422_v0  ;;  %v2394_v36 = vadd.f32 1.0, %v3510_v30 }
 0x380   :  { %v3514_v57 = vpop.eup %3513  ;;  %3515 = vrcp.f32 %v2396_v35  ;;  %v2397_v39 = vadd.f32 1.0, %v3512_v54 }
 0x381   :  { %3517 = vrcp.f32 %v2394_v36  ;;  %v2395_v40 = vadd.f32 1.0, %v3514_v57  ;;  %3010 = vmatpush3.bf16.msra.mxu1 %v2434_v31 }
 0x382   :  { %3519 = vrcp.f32 %v2397_v39  ;;  %3011 = vmatprep.subr.bf16.mxu1 %v3523_v29 }
 0x383   :  { %3521 = vrcp.f32 %v2395_v40 }
 0x385   :  { %3012 = vmatpush3.bf16.msra.mxu1 %v2435_v32 }
 0x386   :  { %3013 = vmatprep.subr.bf16.mxu1 %v3523_v29 }
 0x38a   :  { %v3516_v21 = vpop.eup %3515 }
 0x38b   :  { %v3518_v55 = vpop.eup %3517  ;;  %v2428_v41 = vmul.f32 %v3516_v21, %v4328_v53 }
 0x38c   :  { %v3520_v33 = vpop.eup %3519  ;;  %v2426_v44 = vmul.f32 %v3518_v55, %v4333_v2 }
 0x38d   :  { %v3522_v38 = vpop.eup %3521  ;;  %v2429_v43 = vmul.f32 %v3520_v33, %v2331_v42 }
 0x38e   :  { %v2427_v45 = vmul.f32 %v3522_v38, %v2323_v58 }
 0x38f   :  { %v2437_v46 = vpack.c.bf16 %v2429_v43, %v2428_v41 }
 0x390   :  { %v2436_v47 = vpack.c.bf16 %v2427_v45, %v2426_v44 }
 0x392   :  { %3014 = vmatpush3.bf16.msra.mxu1 %v2436_v47 }
 0x393   :  { %3015 = vmatprep.subr.bf16.mxu1 %v3523_v29  ;;  %v2798_v29 = vld [vmem:[%s4372_s8] ss:$0 sm:$0xff] }
 0x396   :  { %3016 = vmatpush3.bf16.msra.mxu1 %v2437_v46 }
 0x399   :  { %3018 = vmatmul.mubr.bf16.vlgmr.msra.gmra.mrb[64].mxu1 %v2438_v48 }
 0x46c   :  { %v2473_v50 = vpop.f32.mrb[64].mxu1 }
 0x46d   :  { %v2479_v51 = vpack.c.bf16 %v2473_v50, %v2473_v50  ;;  %v3019_v52 = vpop.f32.mrb[65].mxu1 }
 0x46e   :  { %v2476_v53 = vpop.f32.mrb[66].mxu1 }
 0x46f   :  { %v3020_v56 = vpop.f32.mrb[67].mxu1  ;;  %3038 = vmatmul.mubr.bf16.vlgmr.msra.gmra.mrb[80].mxu0 %v2479_v51 }
 0x542   :  { %v2585_v60 = vpop.f32.mrb[80].mxu0 }
 0x543   :  { %v2586_v61 = vadd.f32 %v2798_v29, %v2585_v60  ;;  %v3039_v62 = vpop.f32.mrb[81].mxu0 }
 0x544   :  { %v2588_v2 = vpop.f32.mrb[82].mxu0 }
 0x545   :  { %2591 = vst [vmem:[%s4373_s9] sm:$0xff] %v2586_v61  ;;  %v3040_v3 = vpop.f32.mrb[83].mxu0 }

</bundles_post_ra>
